<compile_context>
chip_gen: v5e
topology: v5e:2x2
jax: 0.10.0
libtpu: 0.0.40
codegen_flags: <defaults>
</compile_context>

<pallas_src>
import functools
import math

import jax
import jax.numpy as jnp
from jax import lax
from jax.experimental import pallas as pl
from jax.experimental.pallas import tpu as pltpu


# ---------------------------------------------------------------------------
# Fused Pallas kernel (one batch element per grid step)
# ---------------------------------------------------------------------------
def _fused_regression_kernel(xp_ref, wbig_ref, bbig_ref, w3_ref, b3_ref,
                             o_ref, xcol_ref, ycol_ref, ypad_ref,
                             *, num, dim, k, H, W, shortcut):
    """Fully fused newRegression_layer forward for one batch element.

    xp_ref:   [1, C, Lp]            zero-padded input, Lp = (H + 2p + 1) * Wp
    wbig_ref: [num + num*dim, kk*C] bf16: conv2 taps stacked over K, conv1
                                    embedded in the center-tap block
    bbig_ref: [num + num*dim, 1]    f32 bias (b2 rows then b1 rows)
    w3_ref:   [dim, kk*dim]         bf16 conv3 taps stacked over K
    b3_ref:   [dim, 1]
    o_ref:    [1, dim, M]           lane-dense output (channel-first)
    xcol_ref: [kk*C, M]   VMEM scratch: stacked conv1/conv2 operand
    ycol_ref: [kk*dim, M] VMEM scratch: stacked conv3 operand
    ypad_ref: [dim, Lp]   VMEM scratch: zero-padded intermediate y
    """
    p = k // 2
    Wp = W + 2 * p
    M = H * Wp
    Sw = M + k - 1                         # slab width covering all dx taps
    c_off = p * Wp + p                     # flat offset of true pixel (0, 0)
    kk = k * k
    C = xp_ref.shape[1]
    Lp = ypad_ref.shape[1]

    # ---- column-validity mask built in-kernel (no HBM mask input) ----------
    # mask[j] = 1.0 iff (j mod Wp) < W.  Built with f32 floor (no int div/rem);
    # the +0.5 margin makes the floor robust to f32 rounding.
    jf = lax.broadcasted_iota(jnp.int32, (1, M), 1).astype(jnp.float32)
    row = jnp.floor((jf + 0.5) * (1.0 / Wp))
    col = jf - row * float(Wp)
    mask = (col < float(W)).astype(jnp.float32)                 # [1, M]

    # ---- assemble xcol [kk*C, M]: k slab reads, dx taps are value slices ----
    x_c = None                              # center tap, reused for shortcut
    for ky in range(k):
        slab = xp_ref[0, :, pl.ds(ky * Wp, Sw)]                 # [C, Sw] f32
        for kx in range(k):
            tap = slab[:, kx:kx + M]                            # [C, M]
            if ky == p and kx == p:
                x_c = tap
            xcol_ref[pl.ds((ky * k + kx) * C, C), :] = tap

    # ---- conv1 (1x1) + conv2 (kxk): ONE stacked matmul, K = kk*C ------------
    zr = jnp.dot(wbig_ref[...], xcol_ref[...].astype(jnp.bfloat16),
                 preferred_element_type=jnp.float32) + bbig_ref[...]
    logits = zr[:num]                                           # [num, M]
    r = zr[num:]                                                # [num*dim, M]

    # ---- softmax over num (f32 VPU/EUP math, exact reciprocal) --------------
    mmax = jnp.max(logits, axis=0, keepdims=True)
    e = jnp.exp(logits - mmax)
    alpha = e * pl.reciprocal(jnp.sum(e, axis=0, keepdims=True))  # [num, M]

    # ---- alpha-weighted reduction over num (cheap VPU work) -----------------
    y = r[0:dim] * alpha[0:1]
    for n in range(1, num):                 # num is small; trace-time unroll
        y = y + r[n * dim:(n + 1) * dim] * alpha[n:n + 1]
    y = y * mask                            # zero the garbage wide-grid cols

    # ---- place y in padded scratch; zero ONLY the halo strips ---------------
    # The interior [c_off, c_off + M) is fully overwritten each step, so the
    # halo-only zeroing is safe even with the batch axis sharded over cores.
    tail = Lp - (c_off + M)
    ypad_ref[:, pl.ds(0, c_off)] = jnp.zeros((dim, c_off), jnp.float32)
    ypad_ref[:, pl.ds(c_off + M, tail)] = jnp.zeros((dim, tail), jnp.float32)
    ypad_ref[:, pl.ds(c_off, M)] = y

    # ---- conv3 (kxk): assemble ycol, ONE stacked matmul K = kk*dim ----------
    for ky in range(k):
        slab = ypad_ref[:, pl.ds(ky * Wp, Sw)]                  # [dim, Sw]
        for kx in range(k):
            ycol_ref[pl.ds((ky * k + kx) * dim, dim), :] = slab[:, kx:kx + M]

    out = jnp.dot(w3_ref[...], ycol_ref[...].astype(jnp.bfloat16),
                  preferred_element_type=jnp.float32) + b3_ref[...]
    if shortcut:
        out = out + x_c                     # f32 residual (needs C == dim)

    o_ref[0] = out.astype(o_ref.dtype)


# ---------------------------------------------------------------------------
# Glue (plain JAX): weight_norm, parameter init, weight repacking
# ---------------------------------------------------------------------------
def _weight_norm(v, g):
    """PyTorch nn.utils.weight_norm (dim=0): w = g * v / ||v|| per out-channel."""
    norm = jnp.sqrt(jnp.sum(v * v, axis=(1, 2, 3), keepdims=True))
    return g * v / norm


def init_params(key, num_channels, k, dim, num):
    """Deterministic synthetic init mirroring nn.Conv2d + weight_norm shapes."""
    def conv_init(key, out_c, in_c, kh, kw):
        kv, kb = jax.random.split(key)
        fan_in = in_c * kh * kw
        gain = math.sqrt(2.0 / (1.0 + 5.0))          # kaiming_uniform(a=sqrt(5))
        bound_w = gain * math.sqrt(3.0 / fan_in)
        v = jax.random.uniform(kv, (out_c, in_c, kh, kw), jnp.float32,
                               -bound_w, bound_w)
        bound_b = 1.0 / math.sqrt(fan_in)
        b = jax.random.uniform(kb, (out_c,), jnp.float32, -bound_b, bound_b)
        g = jnp.sqrt(jnp.sum(v * v, axis=(1, 2, 3), keepdims=True))
        return v, g, b

    k1, k2, k3 = jax.random.split(key, 3)
    v1, g1, b1 = conv_init(k1, num * dim, num_channels, 1, 1)
    v2, g2, b2 = conv_init(k2, num, num_channels, k, k)
    v3, g3, b3 = conv_init(k3, dim, dim, k, k)
    return dict(v1=v1, g1=g1, b1=b1, v2=v2, g2=g2, b2=b2, v3=v3, g3=g3, b3=b3)


def _vmem_limit_bytes(*, C, Lp, M, dim, num, kk):
    """Scoped-VMEM budget derived from actual block/scratch/live sizes."""
    nbig = num + num * dim
    in_blk = C * Lp * 4
    out_blk = dim * M * 4
    weights = nbig * kk * C * 2 + dim * kk * dim * 2 + (nbig + dim) * 4
    scratch = (kk * C + kk * dim) * M * 4 + dim * Lp * 4
    live = (nbig + num + 2 * num * dim + 4 * dim + 2) * M * 4
    total = 2 * (in_blk + out_blk + weights) + scratch + live   # 2x double buffers
    # 2x headroom for compiler temporaries; clamp to [16 MiB, 64 MiB] so the
    # same budget is valid on v7x (64 MiB/TC) while not starving v5e/v6e.
    return int(min(max(2 * total + (4 << 20), 16 << 20), 64 << 20))


# ---------------------------------------------------------------------------
# Forward pass (wrapper around the single fused pallas_call)
# ---------------------------------------------------------------------------
def new_regression_layer(x_nchw, params, *, num, dim, k, flag_shortcut):
    assert k % 2 == 1, "padding=k//2 only gives 'same' output for odd k"
    B, C, H, W = x_nchw.shape
    if flag_shortcut:
        assert C == dim, "shortcut requires num_channels == dim"

    p = k // 2
    Wp = W + 2 * p
    Hp = H + 2 * p + 1          # +1 safety row: shifted slab reads never OOB
    Lp = Hp * Wp
    M = H * Wp
    kk = k * k
    nbig = num + num * dim

    # ---- weight-norm weights, stacked/packed for the fused kernel ----------
    w1 = _weight_norm(params["v1"], params["g1"])[:, :, 0, 0]     # [num*dim, C]
    w2 = _weight_norm(params["v2"], params["g2"])                 # [num, C, k, k]
    w3 = _weight_norm(params["v3"], params["g3"])                 # [dim, dim, k, k]

    # conv2 taps stacked along K (tap-major, channel-minor); conv1 embedded at
    # the center tap so ONE matmul produces logits + r.  MXU operands -> bf16.
    w2s = jnp.transpose(w2, (0, 2, 3, 1)).reshape(num, kk * C)
    w1e = jnp.zeros((num * dim, kk * C), jnp.float32)
    t_c = (p * k + p) * C
    w1e = w1e.at[:, t_c:t_c + C].set(w1)
    wbig = jnp.concatenate([w2s, w1e], axis=0).astype(jnp.bfloat16)   # [nbig, kk*C]
    bbig = jnp.concatenate([params["b2"], params["b1"]]).reshape(nbig, 1)
    w3s = jnp.transpose(w3, (0, 2, 3, 1)).reshape(dim, kk * dim).astype(jnp.bfloat16)
    b3 = params["b3"].reshape(dim, 1)

    # ---- pad spatially ONCE (no im2col in HBM), flatten (free for NCHW) -----
    xpad = jnp.pad(x_nchw, ((0, 0), (0, 0), (p, p + 1), (p, p))).reshape(B, C, Lp)

    flops = 2 * B * M * (nbig * kk * C + dim * kk * dim)
    bytes_accessed = (4 * (B * C * Lp + B * dim * M + nbig + dim)
                      + 2 * (nbig * kk * C + dim * kk * dim))
    cost = pl.CostEstimate(flops=flops, transcendentals=B * M * num,
                           bytes_accessed=bytes_accessed)

    kern = functools.partial(_fused_regression_kernel, num=num, dim=dim, k=k,
                             H=H, W=W, shortcut=flag_shortcut)
    out_wide = pl.pallas_call(
        kern,
        out_shape=jax.ShapeDtypeStruct((B, dim, M), jnp.float32),
        grid=(B,),
        in_specs=[
            pl.BlockSpec((1, C, Lp), lambda b: (b, 0, 0)),
            pl.BlockSpec((nbig, kk * C), lambda b: (0, 0)),
            pl.BlockSpec((nbig, 1), lambda b: (0, 0)),
            pl.BlockSpec((dim, kk * dim), lambda b: (0, 0)),
            pl.BlockSpec((dim, 1), lambda b: (0, 0)),
        ],
        out_specs=pl.BlockSpec((1, dim, M), lambda b: (b, 0, 0)),
        scratch_shapes=[pltpu.VMEM((kk * C, M), jnp.float32),
                        pltpu.VMEM((kk * dim, M), jnp.float32),
                        pltpu.VMEM((dim, Lp), jnp.float32)],
        compiler_params=pltpu.CompilerParams(
            dimension_semantics=("parallel",),
            vmem_limit_bytes=_vmem_limit_bytes(C=C, Lp=Lp, M=M, dim=dim,
                                               num=num, kk=kk)),
        cost_estimate=cost,
    )(xpad, wbig, bbig, w3s, b3)

    # Output is already channel-first & lane-dense: strip the pad columns.
    return out_wide.reshape(B, dim, H, Wp)[:, :, :, :W]          # NCHW


# ---------------------------------------------------------------------------
# Pure-JAX reference (mirrors the PyTorch forward exactly), for verification
# ---------------------------------------------------------------------------
def reference_forward(x, params, *, num, dim, k, flag_shortcut):
    w1 = _weight_norm(params["v1"], params["g1"])
    w2 = _weight_norm(params["v2"], params["g2"])
    w3 = _weight_norm(params["v3"], params["g3"])

    def conv(x, w, b, pad):
        y = lax.conv_general_dilated(
            x, w, (1, 1), [(pad, pad), (pad, pad)],
            dimension_numbers=("NCHW", "OIHW", "NCHW"))
        return y + b[None, :, None, None]

    r = conv(x, w1, params["b1"], 0)                     # [B, num*dim, H, W]
    r = jnp.transpose(r, (0, 2, 3, 1))
    B, H, W, _ = r.shape
    r = r.reshape(B, H, W, num, dim)
    a = conv(x, w2, params["b2"], k // 2)                # [B, num, H, W]
    a = jnp.transpose(a, (0, 2, 3, 1))
    a = jax.nn.softmax(a, axis=-1)[..., None]
    o = jnp.sum(r * a, axis=3)                           # [B, H, W, dim]
    o = jnp.transpose(o, (0, 3, 1, 2))
    o = conv(o, w3, params["b3"], k // 2)
    if flag_shortcut:
        o = o + x
    return o


# ---------------------------------------------------------------------------
if __name__ == "__main__":
    # Small shapes consistent with the module (shortcut requires dim == num_channels).
    B, num_channels, H, W = 2, 4, 16, 16
    k, dim, num, flag_shortcut = 3, 4, 4, True

    key = jax.random.PRNGKey(0)
    kx, kp = jax.random.split(key)
    x = jax.random.normal(kx, (B, num_channels, H, W), jnp.float32)
    params = init_params(kp, num_channels, k, dim, num)

    out = new_regression_layer(x, params, num=num, dim=dim, k=k,
                               flag_shortcut=flag_shortcut)
    out = jax.block_until_ready(out)

    ref = reference_forward(x, params, num=num, dim=dim, k=k,
                            flag_shortcut=flag_shortcut)
    ref = jax.block_until_ready(ref)

    assert out.shape == (B, dim, H, W)
    # Tolerance accounts for the bf16 MXU operands (f32 accumulation) used per
    # the performance review; softmax reciprocal is exact.
    assert jnp.allclose(out, ref, atol=5e-2, rtol=2e-2), (
        float(jnp.max(jnp.abs(out - ref))))
    print("KERNEL_OK")
</pallas_src>

<mosaic_0001>
module attributes {stable_mosaic.version = 11 : i64} {
  func.func @_fused_regression_kernel(%arg0: i32, %arg1: memref<1x4x342xf32, #tpu.memory_space<vmem>>, %arg2: memref<20x36xbf16, #tpu.memory_space<vmem>>, %arg3: memref<20x1xf32, #tpu.memory_space<vmem>>, %arg4: memref<4x36xbf16, #tpu.memory_space<vmem>>, %arg5: memref<4x1xf32, #tpu.memory_space<vmem>>, %arg6: memref<1x4x288xf32, #tpu.memory_space<vmem>>, %arg7: memref<36x288xf32, #tpu.memory_space<vmem>>, %arg8: memref<36x288xf32, #tpu.memory_space<vmem>>, %arg9: memref<4x342xf32, #tpu.memory_space<vmem>>) attributes {dimension_semantics = [#tpu.dimension_semantics<parallel>], iteration_bounds = array<i64: 2>, scalar_prefetch = 0 : i64, scratch_operands = 3 : i64, tpu.core_type = #tpu.core_type<tc>, window_params = [{transform_indices = @transform_0, window_bounds = array<i64: 1, 4, 342>}, {pipeline_mode = #tpu.pipeline_mode<synchronous>, transform_indices = @transform_1, window_bounds = array<i64: 20, 36>}, {pipeline_mode = #tpu.pipeline_mode<synchronous>, transform_indices = @transform_2, window_bounds = array<i64: 20, 1>}, {pipeline_mode = #tpu.pipeline_mode<synchronous>, transform_indices = @transform_3, window_bounds = array<i64: 4, 36>}, {pipeline_mode = #tpu.pipeline_mode<synchronous>, transform_indices = @transform_4, window_bounds = array<i64: 4, 1>}, {transform_indices = @transform_5, window_bounds = array<i64: 1, 4, 288>}]} {
    %0 = tpu.iota {dimensions = array<i32: 1>} : vector<1x288xi32>
    %1 = arith.sitofp %0 : vector<1x288xi32> to vector<1x288xf32>
    %cst = arith.constant 5.000000e-01 : f32
    %2 = vector.broadcast %cst : f32 to vector<1x288xf32>
    %3 = arith.addf %1, %2 : vector<1x288xf32>
    %cst_0 = arith.constant 0.055555556 : f32
    %4 = vector.broadcast %cst_0 : f32 to vector<1x288xf32>
    %5 = arith.mulf %3, %4 : vector<1x288xf32>
    %6 = math.floor %5 : vector<1x288xf32>
    %cst_1 = arith.constant 1.800000e+01 : f32
    %7 = vector.broadcast %cst_1 : f32 to vector<1x288xf32>
    %8 = arith.mulf %6, %7 : vector<1x288xf32>
    %9 = arith.subf %1, %8 : vector<1x288xf32>
    %cst_2 = arith.constant 1.600000e+01 : f32
    %10 = vector.broadcast %cst_2 : f32 to vector<1x288xf32>
    %11 = arith.cmpf olt, %9, %10 : vector<1x288xf32>
    %12 = arith.extui %11 : vector<1x288xi1> to vector<1x288xi32>
    %13 = arith.sitofp %12 : vector<1x288xi32> to vector<1x288xf32>
    %c0 = arith.constant 0 : index
    %c0_3 = arith.constant 0 : index
    %c0_4 = arith.constant 0 : index
    %14 = vector.load %arg1[%c0, %c0_3, %c0_4] : memref<1x4x342xf32, #tpu.memory_space<vmem>>, vector<1x4x290xf32>
    %15 = vector.shape_cast %14 : vector<1x4x290xf32> to vector<4x290xf32>
    %16 = vector.extract_strided_slice %15 {offsets = [0, 0], sizes = [4, 288], strides = [1, 1]} : vector<4x290xf32> to vector<4x288xf32>
    %c0_5 = arith.constant 0 : index
    %c0_6 = arith.constant 0 : index
    %17 = vector.load %arg7[%c0_5, %c0_6] : memref<36x288xf32, #tpu.memory_space<vmem>>, vector<4x288xf32>
    tpu.vector_store %arg7[%c0_5, %c0_6], %16 {strides = array<i32>} : memref<36x288xf32, #tpu.memory_space<vmem>>, vector<4x288xf32>,
    %18 = vector.extract_strided_slice %15 {offsets = [0, 1], sizes = [4, 288], strides = [1, 1]} : vector<4x290xf32> to vector<4x288xf32>
    %c4 = arith.constant 4 : index
    %c0_7 = arith.constant 0 : index
    %19 = vector.load %arg7[%c4, %c0_7] : memref<36x288xf32, #tpu.memory_space<vmem>>, vector<4x288xf32>
    tpu.vector_store %arg7[%c4, %c0_7], %18 {strides = array<i32>} : memref<36x288xf32, #tpu.memory_space<vmem>>, vector<4x288xf32>,
    %20 = vector.extract_strided_slice %15 {offsets = [0, 2], sizes = [4, 288], strides = [1, 1]} : vector<4x290xf32> to vector<4x288xf32>
    %c8 = arith.constant 8 : index
    %c0_8 = arith.constant 0 : index
    %21 = vector.load %arg7[%c8, %c0_8] : memref<36x288xf32, #tpu.memory_space<vmem>>, vector<4x288xf32>
    tpu.vector_store %arg7[%c8, %c0_8], %20 {strides = array<i32>} : memref<36x288xf32, #tpu.memory_space<vmem>>, vector<4x288xf32>,
    %c0_9 = arith.constant 0 : index
    %c0_10 = arith.constant 0 : index
    %c18 = arith.constant 18 : index
    %22 = vector.load %arg1[%c0_9, %c0_10, %c18] : memref<1x4x342xf32, #tpu.memory_space<vmem>>, vector<1x4x290xf32>
    %23 = vector.shape_cast %22 : vector<1x4x290xf32> to vector<4x290xf32>
    %24 = vector.extract_strided_slice %23 {offsets = [0, 0], sizes = [4, 288], strides = [1, 1]} : vector<4x290xf32> to vector<4x288xf32>
    %c12 = arith.constant 12 : index
    %c0_11 = arith.constant 0 : index
    %25 = vector.load %arg7[%c12, %c0_11] : memref<36x288xf32, #tpu.memory_space<vmem>>, vector<4x288xf32>
    tpu.vector_store %arg7[%c12, %c0_11], %24 {strides = array<i32>} : memref<36x288xf32, #tpu.memory_space<vmem>>, vector<4x288xf32>,
    %26 = vector.extract_strided_slice %23 {offsets = [0, 1], sizes = [4, 288], strides = [1, 1]} : vector<4x290xf32> to vector<4x288xf32>
    %c16 = arith.constant 16 : index
    %c0_12 = arith.constant 0 : index
    %27 = vector.load %arg7[%c16, %c0_12] : memref<36x288xf32, #tpu.memory_space<vmem>>, vector<4x288xf32>
    tpu.vector_store %arg7[%c16, %c0_12], %26 {strides = array<i32>} : memref<36x288xf32, #tpu.memory_space<vmem>>, vector<4x288xf32>,
    %28 = vector.extract_strided_slice %23 {offsets = [0, 2], sizes = [4, 288], strides = [1, 1]} : vector<4x290xf32> to vector<4x288xf32>
    %c20 = arith.constant 20 : index
    %c0_13 = arith.constant 0 : index
    %29 = vector.load %arg7[%c20, %c0_13] : memref<36x288xf32, #tpu.memory_space<vmem>>, vector<4x288xf32>
    tpu.vector_store %arg7[%c20, %c0_13], %28 {strides = array<i32>} : memref<36x288xf32, #tpu.memory_space<vmem>>, vector<4x288xf32>,
    %c0_14 = arith.constant 0 : index
    %c0_15 = arith.constant 0 : index
    %c36 = arith.constant 36 : index
    %30 = vector.load %arg1[%c0_14, %c0_15, %c36] : memref<1x4x342xf32, #tpu.memory_space<vmem>>, vector<1x4x290xf32>
    %31 = vector.shape_cast %30 : vector<1x4x290xf32> to vector<4x290xf32>
    %32 = vector.extract_strided_slice %31 {offsets = [0, 0], sizes = [4, 288], strides = [1, 1]} : vector<4x290xf32> to vector<4x288xf32>
    %c24 = arith.constant 24 : index
    %c0_16 = arith.constant 0 : index
    %33 = vector.load %arg7[%c24, %c0_16] : memref<36x288xf32, #tpu.memory_space<vmem>>, vector<4x288xf32>
    tpu.vector_store %arg7[%c24, %c0_16], %32 {strides = array<i32>} : memref<36x288xf32, #tpu.memory_space<vmem>>, vector<4x288xf32>,
    %34 = vector.extract_strided_slice %31 {offsets = [0, 1], sizes = [4, 288], strides = [1, 1]} : vector<4x290xf32> to vector<4x288xf32>
    %c28 = arith.constant 28 : index
    %c0_17 = arith.constant 0 : index
    %35 = vector.load %arg7[%c28, %c0_17] : memref<36x288xf32, #tpu.memory_space<vmem>>, vector<4x288xf32>
    tpu.vector_store %arg7[%c28, %c0_17], %34 {strides = array<i32>} : memref<36x288xf32, #tpu.memory_space<vmem>>, vector<4x288xf32>,
    %36 = vector.extract_strided_slice %31 {offsets = [0, 2], sizes = [4, 288], strides = [1, 1]} : vector<4x290xf32> to vector<4x288xf32>
    %c32 = arith.constant 32 : index
    %c0_18 = arith.constant 0 : index
    %37 = vector.load %arg7[%c32, %c0_18] : memref<36x288xf32, #tpu.memory_space<vmem>>, vector<4x288xf32>
    tpu.vector_store %arg7[%c32, %c0_18], %36 {strides = array<i32>} : memref<36x288xf32, #tpu.memory_space<vmem>>, vector<4x288xf32>,
    %c0_19 = arith.constant 0 : index
    %c0_20 = arith.constant 0 : index
    %38 = vector.load %arg2[%c0_19, %c0_20] : memref<20x36xbf16, #tpu.memory_space<vmem>>, vector<20x36xbf16>
    %c0_21 = arith.constant 0 : index
    %c0_22 = arith.constant 0 : index
    %39 = vector.load %arg7[%c0_21, %c0_22] : memref<36x288xf32, #tpu.memory_space<vmem>>, vector<36x288xf32>
    %40 = arith.truncf %39 : vector<36x288xf32> to vector<36x288xbf16>
    %cst_23 = arith.constant dense<0.000000e+00> : vector<20x288xf32>
    %41 = tpu.matmul %38, %40, %cst_23 {dimension_numbers = #tpu.dot_dimension_numbers<[1], [0], [0], [1], [0, 0, 1, 1], [], []>} : vector<20x36xbf16>, vector<36x288xbf16>, vector<20x288xf32> -> vector<20x288xf32>
    %c0_24 = arith.constant 0 : index
    %c0_25 = arith.constant 0 : index
    %42 = vector.load %arg3[%c0_24, %c0_25] : memref<20x1xf32, #tpu.memory_space<vmem>>, vector<20x1xf32>
    %43 = vector.broadcast %42 : vector<20x1xf32> to vector<20x288xf32>
    %44 = arith.addf %41, %43 : vector<20x288xf32>
    %45 = vector.extract_strided_slice %44 {offsets = [0, 0], sizes = [4, 288], strides = [1, 1]} : vector<20x288xf32> to vector<4x288xf32>
    %46 = vector.extract_strided_slice %44 {offsets = [4, 0], sizes = [16, 288], strides = [1, 1]} : vector<20x288xf32> to vector<16x288xf32>
    %cst_26 = arith.constant dense<0xFF800000> : vector<288xf32>
    %47 = vector.multi_reduction <maximumf>, %45, %cst_26 [0] : vector<4x288xf32> to vector<288xf32>
    %48 = vector.shape_cast %47 : vector<288xf32> to vector<1x288xf32>
    %49 = vector.broadcast %48 : vector<1x288xf32> to vector<4x288xf32>
    %50 = arith.subf %45, %49 : vector<4x288xf32>
    %51 = math.exp %50 : vector<4x288xf32>
    %cst_27 = arith.constant dense<0.000000e+00> : vector<288xf32>
    %52 = vector.multi_reduction <add>, %51, %cst_27 [0] : vector<4x288xf32> to vector<288xf32>
    %53 = vector.shape_cast %52 : vector<288xf32> to vector<1x288xf32>
    %54 = tpu.reciprocal %53 : vector<1x288xf32> -> vector<1x288xf32>
    %55 = vector.broadcast %54 : vector<1x288xf32> to vector<4x288xf32>
    %56 = arith.mulf %51, %55 : vector<4x288xf32>
    %57 = vector.extract_strided_slice %46 {offsets = [0, 0], sizes = [4, 288], strides = [1, 1]} : vector<16x288xf32> to vector<4x288xf32>
    %58 = vector.extract_strided_slice %56 {offsets = [0, 0], sizes = [1, 288], strides = [1, 1]} : vector<4x288xf32> to vector<1x288xf32>
    %59 = vector.broadcast %58 : vector<1x288xf32> to vector<4x288xf32>
    %60 = arith.mulf %57, %59 : vector<4x288xf32>
    %61 = vector.extract_strided_slice %46 {offsets = [4, 0], sizes = [4, 288], strides = [1, 1]} : vector<16x288xf32> to vector<4x288xf32>
    %62 = vector.extract_strided_slice %56 {offsets = [1, 0], sizes = [1, 288], strides = [1, 1]} : vector<4x288xf32> to vector<1x288xf32>
    %63 = vector.broadcast %62 : vector<1x288xf32> to vector<4x288xf32>
    %64 = arith.mulf %61, %63 : vector<4x288xf32>
    %65 = arith.addf %60, %64 : vector<4x288xf32>
    %66 = vector.extract_strided_slice %46 {offsets = [8, 0], sizes = [4, 288], strides = [1, 1]} : vector<16x288xf32> to vector<4x288xf32>
    %67 = vector.extract_strided_slice %56 {offsets = [2, 0], sizes = [1, 288], strides = [1, 1]} : vector<4x288xf32> to vector<1x288xf32>
    %68 = vector.broadcast %67 : vector<1x288xf32> to vector<4x288xf32>
    %69 = arith.mulf %66, %68 : vector<4x288xf32>
    %70 = arith.addf %65, %69 : vector<4x288xf32>
    %71 = vector.extract_strided_slice %46 {offsets = [12, 0], sizes = [4, 288], strides = [1, 1]} : vector<16x288xf32> to vector<4x288xf32>
    %72 = vector.extract_strided_slice %56 {offsets = [3, 0], sizes = [1, 288], strides = [1, 1]} : vector<4x288xf32> to vector<1x288xf32>
    %73 = vector.broadcast %72 : vector<1x288xf32> to vector<4x288xf32>
    %74 = arith.mulf %71, %73 : vector<4x288xf32>
    %75 = arith.addf %70, %74 : vector<4x288xf32>
    %76 = vector.broadcast %13 : vector<1x288xf32> to vector<4x288xf32>
    %77 = arith.mulf %75, %76 : vector<4x288xf32>
    %cst_28 = arith.constant 0.000000e+00 : f32
    %78 = vector.broadcast %cst_28 : f32 to vector<4x19xf32>
    %c0_29 = arith.constant 0 : index
    %c0_30 = arith.constant 0 : index
    %79 = vector.load %arg9[%c0_29, %c0_30] : memref<4x342xf32, #tpu.memory_space<vmem>>, vector<4x19xf32>
    tpu.vector_store %arg9[%c0_29, %c0_30], %78 {strides = array<i32>} : memref<4x342xf32, #tpu.memory_space<vmem>>, vector<4x19xf32>,
    %cst_31 = arith.constant 0.000000e+00 : f32
    %80 = vector.broadcast %cst_31 : f32 to vector<4x35xf32>
    %c0_32 = arith.constant 0 : index
    %c307 = arith.constant 307 : index
    %81 = vector.load %arg9[%c0_32, %c307] : memref<4x342xf32, #tpu.memory_space<vmem>>, vector<4x35xf32>
    tpu.vector_store %arg9[%c0_32, %c307], %80 {strides = array<i32>} : memref<4x342xf32, #tpu.memory_space<vmem>>, vector<4x35xf32>,
    %c0_33 = arith.constant 0 : index
    %c19 = arith.constant 19 : index
    %82 = vector.load %arg9[%c0_33, %c19] : memref<4x342xf32, #tpu.memory_space<vmem>>, vector<4x288xf32>
    tpu.vector_store %arg9[%c0_33, %c19], %77 {strides = array<i32>} : memref<4x342xf32, #tpu.memory_space<vmem>>, vector<4x288xf32>,
    %c0_34 = arith.constant 0 : index
    %c0_35 = arith.constant 0 : index
    %83 = vector.load %arg9[%c0_34, %c0_35] : memref<4x342xf32, #tpu.memory_space<vmem>>, vector<4x290xf32>
    %84 = vector.extract_strided_slice %83 {offsets = [0, 0], sizes = [4, 288], strides = [1, 1]} : vector<4x290xf32> to vector<4x288xf32>
    %c0_36 = arith.constant 0 : index
    %c0_37 = arith.constant 0 : index
    %85 = vector.load %arg8[%c0_36, %c0_37] : memref<36x288xf32, #tpu.memory_space<vmem>>, vector<4x288xf32>
    tpu.vector_store %arg8[%c0_36, %c0_37], %84 {strides = array<i32>} : memref<36x288xf32, #tpu.memory_space<vmem>>, vector<4x288xf32>,
    %86 = vector.extract_strided_slice %83 {offsets = [0, 1], sizes = [4, 288], strides = [1, 1]} : vector<4x290xf32> to vector<4x288xf32>
    %c4_38 = arith.constant 4 : index
    %c0_39 = arith.constant 0 : index
    %87 = vector.load %arg8[%c4_38, %c0_39] : memref<36x288xf32, #tpu.memory_space<vmem>>, vector<4x288xf32>
    tpu.vector_store %arg8[%c4_38, %c0_39], %86 {strides = array<i32>} : memref<36x288xf32, #tpu.memory_space<vmem>>, vector<4x288xf32>,
    %88 = vector.extract_strided_slice %83 {offsets = [0, 2], sizes = [4, 288], strides = [1, 1]} : vector<4x290xf32> to vector<4x288xf32>
    %c8_40 = arith.constant 8 : index
    %c0_41 = arith.constant 0 : index
    %89 = vector.load %arg8[%c8_40, %c0_41] : memref<36x288xf32, #tpu.memory_space<vmem>>, vector<4x288xf32>
    tpu.vector_store %arg8[%c8_40, %c0_41], %88 {strides = array<i32>} : memref<36x288xf32, #tpu.memory_space<vmem>>, vector<4x288xf32>,
    %c0_42 = arith.constant 0 : index
    %c18_43 = arith.constant 18 : index
    %90 = vector.load %arg9[%c0_42, %c18_43] : memref<4x342xf32, #tpu.memory_space<vmem>>, vector<4x290xf32>
    %91 = vector.extract_strided_slice %90 {offsets = [0, 0], sizes = [4, 288], strides = [1, 1]} : vector<4x290xf32> to vector<4x288xf32>
    %c12_44 = arith.constant 12 : index
    %c0_45 = arith.constant 0 : index
    %92 = vector.load %arg8[%c12_44, %c0_45] : memref<36x288xf32, #tpu.memory_space<vmem>>, vector<4x288xf32>
    tpu.vector_store %arg8[%c12_44, %c0_45], %91 {strides = array<i32>} : memref<36x288xf32, #tpu.memory_space<vmem>>, vector<4x288xf32>,
    %93 = vector.extract_strided_slice %90 {offsets = [0, 1], sizes = [4, 288], strides = [1, 1]} : vector<4x290xf32> to vector<4x288xf32>
    %c16_46 = arith.constant 16 : index
    %c0_47 = arith.constant 0 : index
    %94 = vector.load %arg8[%c16_46, %c0_47] : memref<36x288xf32, #tpu.memory_space<vmem>>, vector<4x288xf32>
    tpu.vector_store %arg8[%c16_46, %c0_47], %93 {strides = array<i32>} : memref<36x288xf32, #tpu.memory_space<vmem>>, vector<4x288xf32>,
    %95 = vector.extract_strided_slice %90 {offsets = [0, 2], sizes = [4, 288], strides = [1, 1]} : vector<4x290xf32> to vector<4x288xf32>
    %c20_48 = arith.constant 20 : index
    %c0_49 = arith.constant 0 : index
    %96 = vector.load %arg8[%c20_48, %c0_49] : memref<36x288xf32, #tpu.memory_space<vmem>>, vector<4x288xf32>
    tpu.vector_store %arg8[%c20_48, %c0_49], %95 {strides = array<i32>} : memref<36x288xf32, #tpu.memory_space<vmem>>, vector<4x288xf32>,
    %c0_50 = arith.constant 0 : index
    %c36_51 = arith.constant 36 : index
    %97 = vector.load %arg9[%c0_50, %c36_51] : memref<4x342xf32, #tpu.memory_space<vmem>>, vector<4x290xf32>
    %98 = vector.extract_strided_slice %97 {offsets = [0, 0], sizes = [4, 288], strides = [1, 1]} : vector<4x290xf32> to vector<4x288xf32>
    %c24_52 = arith.constant 24 : index
    %c0_53 = arith.constant 0 : index
    %99 = vector.load %arg8[%c24_52, %c0_53] : memref<36x288xf32, #tpu.memory_space<vmem>>, vector<4x288xf32>
    tpu.vector_store %arg8[%c24_52, %c0_53], %98 {strides = array<i32>} : memref<36x288xf32, #tpu.memory_space<vmem>>, vector<4x288xf32>,
    %100 = vector.extract_strided_slice %97 {offsets = [0, 1], sizes = [4, 288], strides = [1, 1]} : vector<4x290xf32> to vector<4x288xf32>
    %c28_54 = arith.constant 28 : index
    %c0_55 = arith.constant 0 : index
    %101 = vector.load %arg8[%c28_54, %c0_55] : memref<36x288xf32, #tpu.memory_space<vmem>>, vector<4x288xf32>
    tpu.vector_store %arg8[%c28_54, %c0_55], %100 {strides = array<i32>} : memref<36x288xf32, #tpu.memory_space<vmem>>, vector<4x288xf32>,
    %102 = vector.extract_strided_slice %97 {offsets = [0, 2], sizes = [4, 288], strides = [1, 1]} : vector<4x290xf32> to vector<4x288xf32>
    %c32_56 = arith.constant 32 : index
    %c0_57 = arith.constant 0 : index
    %103 = vector.load %arg8[%c32_56, %c0_57] : memref<36x288xf32, #tpu.memory_space<vmem>>, vector<4x288xf32>
    tpu.vector_store %arg8[%c32_56, %c0_57], %102 {strides = array<i32>} : memref<36x288xf32, #tpu.memory_space<vmem>>, vector<4x288xf32>,
    %c0_58 = arith.constant 0 : index
    %c0_59 = arith.constant 0 : index
    %104 = vector.load %arg4[%c0_58, %c0_59] : memref<4x36xbf16, #tpu.memory_space<vmem>>, vector<4x36xbf16>
    %c0_60 = arith.constant 0 : index
    %c0_61 = arith.constant 0 : index
    %105 = vector.load %arg8[%c0_60, %c0_61] : memref<36x288xf32, #tpu.memory_space<vmem>>, vector<36x288xf32>
    %106 = arith.truncf %105 : vector<36x288xf32> to vector<36x288xbf16>
    %cst_62 = arith.constant dense<0.000000e+00> : vector<4x288xf32>
    %107 = tpu.matmul %104, %106, %cst_62 {dimension_numbers = #tpu.dot_dimension_numbers<[1], [0], [0], [1], [0, 0, 1, 1], [], []>} : vector<4x36xbf16>, vector<36x288xbf16>, vector<4x288xf32> -> vector<4x288xf32>
    %c0_63 = arith.constant 0 : index
    %c0_64 = arith.constant 0 : index
    %108 = vector.load %arg5[%c0_63, %c0_64] : memref<4x1xf32, #tpu.memory_space<vmem>>, vector<4x1xf32>
    %109 = vector.broadcast %108 : vector<4x1xf32> to vector<4x288xf32>
    %110 = arith.addf %107, %109 : vector<4x288xf32>
    %111 = arith.addf %110, %26 : vector<4x288xf32>
    %c0_65 = arith.constant 0 : index
    %c0_66 = arith.constant 0 : index
    %c0_67 = arith.constant 0 : index
    %112 = vector.load %arg6[%c0_65, %c0_66, %c0_67] : memref<1x4x288xf32, #tpu.memory_space<vmem>>, vector<1x4x288xf32>
    %113 = vector.shape_cast %112 : vector<1x4x288xf32> to vector<4x288xf32>
    %114 = vector.shape_cast %111 : vector<4x288xf32> to vector<1x4x288xf32>
    tpu.vector_store %arg6[%c0_65, %c0_66, %c0_67], %114 {strides = array<i32>} : memref<1x4x288xf32, #tpu.memory_space<vmem>>, vector<1x4x288xf32>,
    return
  }
  func.func @transform_0(%arg0: i32) -> (i32, i32, i32) {
    %c0_i32 = arith.constant 0 : i32
    %c0_i32_0 = arith.constant 0 : i32
    %c0_i32_1 = arith.constant 0 : i32
    return %arg0, %c0_i32, %c0_i32_0 : i32, i32, i32
  }
  func.func @transform_1(%arg0: i32) -> (i32, i32) {
    %c0_i32 = arith.constant 0 : i32
    %c0_i32_0 = arith.constant 0 : i32
    %c0_i32_1 = arith.constant 0 : i32
    return %c0_i32, %c0_i32_0 : i32, i32
  }
  func.func @transform_2(%arg0: i32) -> (i32, i32) {
    %c0_i32 = arith.constant 0 : i32
    %c0_i32_0 = arith.constant 0 : i32
    %c0_i32_1 = arith.constant 0 : i32
    return %c0_i32, %c0_i32_0 : i32, i32
  }
  func.func @transform_3(%arg0: i32) -> (i32, i32) {
    %c0_i32 = arith.constant 0 : i32
    %c0_i32_0 = arith.constant 0 : i32
    %c0_i32_1 = arith.constant 0 : i32
    return %c0_i32, %c0_i32_0 : i32, i32
  }
  func.func @transform_4(%arg0: i32) -> (i32, i32) {
    %c0_i32 = arith.constant 0 : i32
    %c0_i32_0 = arith.constant 0 : i32
    %c0_i32_1 = arith.constant 0 : i32
    return %c0_i32, %c0_i32_0 : i32, i32
  }
  func.func @transform_5(%arg0: i32) -> (i32, i32, i32) {
    %c0_i32 = arith.constant 0 : i32
    %c0_i32_0 = arith.constant 0 : i32
    %c0_i32_1 = arith.constant 0 : i32
    return %arg0, %c0_i32, %c0_i32_0 : i32, i32, i32
  }
}

</mosaic_0001>

<bundles_post_ra>
// kernel: tpu_custom_call.1
= control target key start
LH: loop header
LB: loop body
LE: loop exit
PB: predicated region body
PF: predicated region fallthrough
CT: control target
= control target key end

     0   :  { %10 = vsyncpa [#allocation6], 0  ;;  %s1773_s0 = inlined_call_operand.vmem [shape: f32[2,4,342], index: 0, kind: input, shape index: {}]   ;;  %s1774_s1 = inlined_call_operand.hbm [shape: bf16[20,36], index: 1, kind: input, shape index: {}]   ;;  %s1775_s2 = inlined_call_operand.vmem [shape: f32[20,1], index: 2, kind: input, shape index: {}]   ;;  %s1776_s3 = inlined_call_operand.vmem [shape: bf16[4,36], index: 3, kind: input, shape index: {}]   ;;  %s1777_s4 = inlined_call_operand.vmem [shape: f32[4,1], index: 4, kind: input, shape index: {}]   ;;  %s1778_s5 = inlined_call_operand.hbm [shape: f32[2,4,288], index: 5, kind: output, shape index: {}]  }
   0x1   :  { %11 = vsyncpa [#allocation7], 0 }
   0x2   :  { %13 = vsyncpa [#allocation7 + $0x1], 0  ;;  %s1410_s18 = smov 0   ;;  %s1412_s19 = smov 0  }
   0x3   :  { %s1414_s20 = smov 0   ;;  %s1416_s21 = smov 0  }
   0x4 LB: > { %s1431_s22 = sadd.s32 4294967295, %s1364_s21   ;;  %s1160_s23 = sadd.s32 4294967294, %s1364_s21   ;;  %s1364_s21 = sphi %s1416_s21, %s1797_s21   ;;  %s1360_s20 = sphi %s1414_s20, %s1796_s20   ;;  %s1356_s19 = sphi %s1412_s19, %s1795_s19   ;;  %s1352_s18 = sphi %s1410_s18, %s1794_s18  }
   0x5   : > { %s1435_s24 = sadd.s32 1, %s1364_s21   ;;  %s136_s25 = sadd.s32 1, %s1360_s20 }
   0x6   : > { %s133_s26 = ssub.s32 %s1364_s21, %s1435_s24  ;;  %p146_p0 = scmp.ne.s32.totalorder %s1360_s20, %s1356_s19 }
   0x7   : > { %p134_p1 = scmp.eq.s32.totalorder %s133_s26, 0  ;;  %p147_p2 = scmp.eq.s32.totalorder %s1431_s22, 1 }
   0x8   : > { %p152_p3 = scmp.ne.s32.totalorder %s1356_s19, %s1352_s18  ;;  %p153_p4 = scmp.eq.s32.totalorder %s1160_s23, 1 }
   0x9   : > { %s1446_s27 = scalar_select %p134_p1, %s1360_s20, %s136_s25  }
   0xa   : > { %p1448_p5 = por %p147_p2, %p146_p0  ;;  %p1452_p6 = por %p153_p4, %p152_p3 }
   0xb   : > { %p1161_p7 = scmp.ge.s32.totalorder %s1364_s21, 1  ;;  %p160_p8 = scmp.lt.s32.totalorder %s1364_s21, 3 }
   0xc   : > { %p1204_p9 = scmp.eq.s32.totalorder %s1431_s22, 0  ;;  %s171_s7 = sshll.u32 %s1774_s1, 4  ;;  %s172_s7 = int_to_ptr.hbm [resolvable:$true] %s171_s7 }
   0xd   : > { %p161_p10 = pnand %p1161_p7, %p160_p8  ;;  %s1366_s8 = smov [#allocation5]  }
   0xe   : > { %s173_s9 = sshll.u32 %s1366_s8, 4  ;;  %s1367_s10 = smov 64   ;;  %s174_s9 = int_to_ptr.vmem [resolvable:$true] %s173_s9 }
   0xf   : > { %p1196_p11 = pneg %p161_p10  ;;  %s1368_s11 = smov 4  }
  0x10   : > { %206 = sbr.rel (%p161_p10) target bundleno = 966 (0x3c6), region = 40 }
  0x11   : > { %p1197_p12 = pnand %p1204_p9, %p1196_p11 }
  0x13   : > { %1199 = dma.hbm_to_vmem [thread:$0]  (!%p1197_p12), %s172_s7, 192, %s174_s9, [#allocation6], %s1367_s10, %s1367_s10, %s1368_s11  }
  0x15   : > { %1343 = dma.done.wait (%p1204_p9), [#allocation6], 192  }
  0x16   : > { %1345 = vsyncadd (%p1204_p9), [#allocation6], 4294967104  ;;  %p235_p13 = scmp.lt.s32.totalorder %s1431_s22, 1  ;;  %s1369_s17 = smov 127   ;;  %vm287_vm0 = vcmask 257024   ;;  %vm310_vm1 = vcmask 261124  }
  0x17   : > { %s1370_s23 = smov 109   ;;  %s1371_s25 = smov 108   ;;  %vm302_vm2 = vcmask 1039360   ;;  %vm371_vm3 = vcmask 891904   ;;  %vm393_vm4 = vcmask 883712   ;;  %vm418_vm5 = vcmask 752640  }
  0x18   : > { %s236_s12 = scalar_select %p235_p13, %s1431_s22, 1  ;;  %vm440_vm6 = vcmask 744448   ;;  %vm324_vm7 = vcmask 1031168   ;;  %v1377_v60 = vmov 0   ;;  %vm461_vm8 = vcmask 736256   ;;  %v497_v63 = vld [vmem:[%s1775_s2] sm:$0xff] }
  0x19   : > { %s1372_s26 = smov 92   ;;  %s1373_s30 = smov 91   ;;  %1253 = vset.pattern.permute.xlu0 %v1377_v60  ;;  %1254 = vset.pattern.permute.xlu1 %v1377_v60  ;;  %vm1782_vm9 = vcmask 1041408   ;;  %vm1781_vm10 = vcmask 900096   ;;  %vm1780_vm11 = vcmask 293888   ;;  %vm1779_vm12 = vcmask 1043456  }
  0x1a   : > { %s1188_s13 = smul.u32 12, %s236_s12  ;;  %s1374_s6 = smov 90   ;;  %1255 = vset.pattern.permute.xlu2 %v1377_v60 }
  0x1b   : > { %s1375_s7 = smov 126   ;;  %s1376_s8 = smov 110  }
  0x1c   : > { %s1473_s16 = scalar_lea.vmem %s1773_s0, %s1188_s13  ;;  %s1379_s15 = smov 19  }
  0x1d   : > { %v273_v0 = vld [vmem:[%s1473_s16 + $0x8] sm:$0xf]  ;;  %v1477_v1 = vld [vmem:[%s1473_s16] sm:$0xff] }
  0x1e   : > { %278 = vst [vmem:[#allocation1 + $0x10] ss:$2 sm:$0xff] %v273_v0  ;;  %v1488_v8 = vld [vmem:[%s1473_s16 + $0x8] sm:$0xf] }
  0x1f   : > { %276 = vst [vmem:[#allocation1] ss:$2 sm:$0xff] %v1477_v1  ;;  %v403_v18 = vld [vmem:[%s1473_s16 + $0x8] sm:$0xf] }
  0x25   : > { %v1480_v2 = vld.sshfl [vmem:[#allocation1 + $0x10] sm:$0xff pattern:$0x75316420] }
  0x26   : > { %292 = vst [vmem:[#allocation1 + $0x11] ss:$2 sm:$0xff] %v273_v0  ;;  %v279_v3 = vld.sshfl [vmem:[#allocation1] sm:$0xff pattern:$0x75316420] }
  0x27   : > { %v280_v4 = vld.sshfl [vmem:[#allocation1 + $0x8] sm:$0xff pattern:$0x75316420]  ;;  %285 = vst [vmem:[#allocation2] sm:$0xf] %v279_v3 }
  0x28   : > { %290 = vst [vmem:[#allocation1 + $0x1] ss:$2 sm:$0xff] %v1477_v1 }
  0x29   : > { %286 = vst [vmem:[#allocation2 + $0x8] sm:$0xf] %v280_v4 }
  0x2a   : > { %288 = vst.msk [vmem:[#allocation2 + $0x10] sm:$0xf] %vm287_vm0, %v1480_v2 }
  0x2d   : > { %v295_v5 = vld.sshfl [vmem:[#allocation1 + $0x10] sm:$0xff pattern:$0x75316420] }
  0x2e   : > { %300 = vrot.lane.b32.xlu2 %v295_v5, %s1369_s17  ;;  %314 = vst [vmem:[#allocation1 + $0x10] ss:$2 sm:$0xff] %v273_v0  ;;  %v498_v0 = vld [vmem:[%s1775_s2 + $0x8] sm:$0xff] }
  0x2f   : > { %v294_v6 = vld.sshfl [vmem:[#allocation1 + $0x8] sm:$0xff pattern:$0x75316420]  ;;  %v293_v7 = vld.sshfl [vmem:[#allocation1] sm:$0xff pattern:$0x75316420] }
  0x30   : > { %298 = vrot.lane.b32.xlu1 %v294_v6, %s1369_s17  ;;  %296 = vrot.lane.b32.xlu0 %v293_v7, %s1369_s17  ;;  %312 = vst [vmem:[#allocation1] ss:$2 sm:$0xff] %v1477_v1 }
  0x35   : > { %v317_v9 = vld.sshfl [vmem:[#allocation1 + $0x10] sm:$0xff pattern:$0x75316420] }
  0x36   : > { %340 = vst [vmem:[#allocation1 + $0x11] ss:$2 sm:$0xff] %v1488_v8 }
  0x37   : > { %v315_v10 = vld.sshfl [vmem:[#allocation1] sm:$0xff pattern:$0x75316420]  ;;  %v316_v11 = vld.sshfl [vmem:[#allocation1 + $0x8] sm:$0xff pattern:$0x75316420] }
  0x38   : > { %338 = vst [vmem:[#allocation1 + $0x1] ss:$2 sm:$0xff] %v1477_v1 }
  0x3d   : > { %v343_v12 = vld.sshfl [vmem:[#allocation1 + $0x10] sm:$0xff pattern:$0x75316420] }
  0x3e   : > { %361 = vst [vmem:[#allocation1 + $0x10] ss:$2 sm:$0xff] %v1488_v8 }
  0x3f   : > { %v341_v13 = vld.sshfl [vmem:[#allocation1] sm:$0xff pattern:$0x75316420]  ;;  %v342_v14 = vld.sshfl [vmem:[#allocation1 + $0x8] sm:$0xff pattern:$0x75316420] }
  0x40   : > { %359 = vst [vmem:[#allocation1] ss:$2 sm:$0xff] %v1477_v1 }
  0x45   : > { %v364_v15 = vld.sshfl [vmem:[#allocation1 + $0x10] sm:$0xff pattern:$0x75316420] }
  0x46   : > { %383 = vst [vmem:[#allocation1 + $0x11] ss:$2 sm:$0xff] %v1488_v8 }
  0x47   : > { %v363_v16 = vld.sshfl [vmem:[#allocation1 + $0x8] sm:$0xff pattern:$0x75316420]  ;;  %v362_v17 = vld.sshfl [vmem:[#allocation1] sm:$0xff pattern:$0x75316420] }
  0x48   : > { %367 = vrot.lane.b32.xlu2 %v363_v16, %s1370_s23  ;;  %365 = vrot.lane.b32.xlu1 %v362_v17, %s1370_s23  ;;  %381 = vst [vmem:[#allocation1 + $0x1] ss:$2 sm:$0xff] %v1477_v1 }
  0x4d   : > { %v386_v19 = vld.sshfl [vmem:[#allocation1 + $0x10] sm:$0xff pattern:$0x75316420] }
  0x4e   : > { %408 = vst [vmem:[#allocation1 + $0x10] ss:$2 sm:$0xff] %v403_v18 }
  0x4f   : > { %v385_v20 = vld.sshfl [vmem:[#allocation1 + $0x8] sm:$0xff pattern:$0x75316420]  ;;  %v384_v21 = vld.sshfl [vmem:[#allocation1] sm:$0xff pattern:$0x75316420] }
  0x50   : > { %369 = vrot.lane.b32.xlu2 %v364_v15, %s1370_s23  ;;  %389 = vrot.lane.b32.xlu1 %v385_v20, %s1371_s25  ;;  %406 = vst [vmem:[#allocation1] ss:$2 sm:$0xff] %v1477_v1 }
  0x51   : > { %387 = vrot.lane.b32.xlu0 %v384_v21, %s1371_s25 }
  0x55   : > { %v411_v22 = vld.sshfl [vmem:[#allocation1 + $0x10] sm:$0xff pattern:$0x75316420] }
  0x56   : > { %430 = vst [vmem:[#allocation1 + $0x11] ss:$2 sm:$0xff] %v403_v18 }
  0x57   : > { %v410_v23 = vld.sshfl [vmem:[#allocation1 + $0x8] sm:$0xff pattern:$0x75316420]  ;;  %v409_v24 = vld.sshfl [vmem:[#allocation1] sm:$0xff pattern:$0x75316420] }
  0x58   : > { %391 = vrot.lane.b32.xlu2 %v386_v19, %s1371_s25  ;;  %414 = vrot.lane.b32.xlu1 %v410_v23, %s1372_s26  ;;  %428 = vst [vmem:[#allocation1 + $0x1] ss:$2 sm:$0xff] %v1477_v1 }
  0x59   : > { %412 = vrot.lane.b32.xlu0 %v409_v24, %s1372_s26 }
  0x5d   : > { %v433_v25 = vld.sshfl [vmem:[#allocation1 + $0x10] sm:$0xff pattern:$0x75316420] }
  0x5e   : > { %451 = vst [vmem:[#allocation1 + $0x10] ss:$2 sm:$0xff] %v403_v18 }
  0x5f   : > { %v432_v26 = vld.sshfl [vmem:[#allocation1 + $0x8] sm:$0xff pattern:$0x75316420]  ;;  %v431_v27 = vld.sshfl [vmem:[#allocation1] sm:$0xff pattern:$0x75316420] }
  0x60   : > { %416 = vrot.lane.b32.xlu2 %v411_v22, %s1372_s26  ;;  %436 = vrot.lane.b32.xlu1 %v432_v26, %s1373_s30  ;;  %449 = vst [vmem:[#allocation1] ss:$2 sm:$0xff] %v1477_v1  ;;  %v1186_v22 = vld [vmem:[#allocation5] sm:$0xff] }
  0x61   : > { %434 = vrot.lane.b32.xlu0 %v431_v27, %s1373_s30 }
  0x65   : > { %v454_v28 = vld.sshfl [vmem:[#allocation1 + $0x10] sm:$0xff pattern:$0x75316420] }
  0x67   : > { %v452_v29 = vld.sshfl [vmem:[#allocation1] sm:$0xff pattern:$0x75316420]  ;;  %v453_v30 = vld.sshfl [vmem:[#allocation1 + $0x8] sm:$0xff pattern:$0x75316420] }
  0x68   : > { %438 = vrot.lane.b32.xlu2 %v433_v25, %s1373_s30  ;;  %459 = vrot.lane.b32.xlu1 %v454_v28, %s1374_s6 }
  0x69   : > { %455 = vrot.lane.b32.xlu0 %v452_v29, %s1374_s6 }
  0x70   : > { %322 = vrot.lane.b32.xlu2 %v317_v9, %s1375_s7  ;;  %320 = vrot.lane.b32.xlu1 %v316_v11, %s1375_s7 }
  0x71   : > { %457 = vrot.lane.b32.xlu0 %v453_v30, %s1374_s6 }
  0x78   : > { %348 = vrot.lane.b32.xlu2 %v343_v12, %s1376_s8  ;;  %346 = vrot.lane.b32.xlu1 %v342_v14, %s1376_s8 }
  0x79   : > { %318 = vrot.lane.b32.xlu0 %v315_v10, %s1375_s7 }
  0x80   : > { %507 = vperm.xlu1 %1254, %v498_v0  }
  0x81   : > { %344 = vrot.lane.b32.xlu0 %v341_v13, %s1376_s8 }
  0x88   : > { %v301_v31 = vpop.permute.xlu2 %300 }
  0x89   : > { %311 = vst.msk [vmem:[#allocation2 + $0x10] sm:$0xf0] %vm310_vm1, %v301_v31  ;;  %502 = vperm.xlu0 %1253, %v497_v63  }
  0x90   : > { %v475_v16 = vld [vmem:[#allocation2 + $0x10] sm:$0xff] }
  0xa2   : > { %v368_v32 = vpop.permute.xlu2 %367  ;;  %v299_v33 = vpop.permute.xlu1 %298 }
  0xa3   : > { %v304_v34 = vsel %vm302_vm2, %v299_v33, %v301_v31  ;;  %v297_v35 = vpop.permute.xlu0 %296  ;;  %v499_v31 = vld [vmem:[%s1775_s2 + $0x10] sm:$0xf] }
  0xa4   : > { %309 = vst [vmem:[#allocation2 + $0x8] sm:$0xf0] %v304_v34  ;;  %v303_v36 = vsel %vm302_vm2, %v297_v35, %v299_v33  ;;  %512 = vperm.xlu2 %1255, %v499_v31  }
  0xa5   : > { %308 = vst [vmem:[#allocation2] sm:$0xf0] %v303_v36 }
  0xaa   : > { %v370_v37 = vpop.permute.xlu2 %369 }
  0xab   : > { %v373_v38 = vsel %vm371_vm3, %v368_v32, %v370_v37  ;;  %379 = vst.msk [vmem:[#allocation2 + $0x40] sm:$0xf] %vm287_vm0, %v370_v37  ;;  %v474_v36 = vld [vmem:[#allocation2 + $0x8] sm:$0xff] }
  0xac   : > { %378 = vst [vmem:[#allocation2 + $0x38] sm:$0xf] %v373_v38  ;;  %v472_v38 = vld [vmem:[#allocation5 + $0x8] sm:$0x3] }
  0xb2   : > { %v392_v39 = vpop.permute.xlu2 %391 }
  0xb3   : > { %401 = vst.msk [vmem:[#allocation2 + $0x40] sm:$0xf0] %vm310_vm1, %v392_v39 }
  0xba   : > { %v417_v40 = vpop.permute.xlu2 %416  ;;  %v366_v41 = vpop.permute.xlu1 %365  ;;  %v481_v9 = vld [vmem:[#allocation2 + $0x40] sm:$0xff] }
  0xbb   : > { %426 = vst.msk [vmem:[#allocation2 + $0x58] sm:$0xf] %vm287_vm0, %v417_v40  ;;  %v372_v42 = vsel %vm371_vm3, %v366_v41, %v368_v32 }
  0xbc   : > { %377 = vst [vmem:[#allocation2 + $0x30] sm:$0xf] %v372_v42 }
  0xc2   : > { %v439_v43 = vpop.permute.xlu2 %438  ;;  %v390_v44 = vpop.permute.xlu1 %389 }
  0xc3   : > { %448 = vst.msk [vmem:[#allocation2 + $0x58] sm:$0xf0] %vm310_vm1, %v439_v43  ;;  %v395_v45 = vsel %vm393_vm4, %v390_v44, %v392_v39  ;;  %v388_v46 = vpop.permute.xlu0 %387  ;;  %v520_v39 = vunpack.c.l.b16 %v472_v38 }
  0xc4   : > { %400 = vst [vmem:[#allocation2 + $0x38] sm:$0xf0] %v395_v45  ;;  %v394_v47 = vsel %vm393_vm4, %v388_v46, %v390_v44 }
  0xc5   : > { %399 = vst [vmem:[#allocation2 + $0x30] sm:$0xf0] %v394_v47 }
  0xca   : > { %v323_v48 = vpop.permute.xlu2 %322  ;;  %v415_v49 = vpop.permute.xlu1 %414  ;;  %v484_v10 = vld [vmem:[#allocation2 + $0x58] sm:$0xff] }
  0xcb   : > { %332 = vst.msk [vmem:[#allocation2 + $0x28] sm:$0xf] %vm287_vm0, %v323_v48  ;;  %v420_v50 = vsel %vm418_vm5, %v415_v49, %v417_v40  ;;  %v413_v51 = vpop.permute.xlu0 %412  ;;  %v493_v11 = vpack.c.bf16 %v484_v10, %v481_v9  ;;  %v480_v30 = vld [vmem:[#allocation2 + $0x38] sm:$0xff]  ;;  %v473_v40 = vld [vmem:[#allocation2] sm:$0xff] }
  0xcc   : > { %425 = vst [vmem:[#allocation2 + $0x50] sm:$0xf] %v420_v50  ;;  %v419_v52 = vsel %vm418_vm5, %v413_v51, %v415_v49  ;;  %v479_v28 = vld [vmem:[#allocation2 + $0x30] sm:$0xff] }
  0xcd   : > { %424 = vst [vmem:[#allocation2 + $0x48] sm:$0xf] %v419_v52 }
  0xd2   : > { %v349_v53 = vpop.permute.xlu2 %348  ;;  %v437_v54 = vpop.permute.xlu1 %436 }
  0xd3   : > { %358 = vst.msk [vmem:[#allocation2 + $0x28] sm:$0xf0] %vm310_vm1, %v349_v53  ;;  %v442_v55 = vsel %vm440_vm6, %v437_v54, %v439_v43  ;;  %v435_v56 = vpop.permute.xlu0 %434  ;;  %v522_v43 = vpack.c.b16 %v520_v39, %v520_v39 }
  0xd4   : > { %447 = vst [vmem:[#allocation2 + $0x50] sm:$0xf0] %v442_v55  ;;  %v441_v57 = vsel %vm440_vm6, %v435_v56, %v437_v54 }
  0xd5   : > { %446 = vst [vmem:[#allocation2 + $0x48] sm:$0xf0] %v441_v57 }
  0xda   : > { %v460_v58 = vpop.permute.xlu1 %459  ;;  %v478_v12 = vld [vmem:[#allocation2 + $0x28] sm:$0xff] }
  0xdb   : > { %469 = vst.msk [vmem:[#allocation2 + $0x70] sm:$0xf] %vm287_vm0, %v460_v58  ;;  %v456_v59 = vpop.permute.xlu0 %455  ;;  %v490_v18 = vpack.c.bf16 %v478_v12, %v475_v16  ;;  %v483_v27 = vld [vmem:[#allocation2 + $0x50] sm:$0xff]  ;;  %v241_v12 = vlaneseq }
  0xdc   : > { %v482_v25 = vld [vmem:[#allocation2 + $0x48] sm:$0xff]  ;;  %v492_v33 = vpack.c.bf16 %v483_v27, %v480_v30 }
  0xdd   : > { %v491_v29 = vpack.c.bf16 %v482_v25, %v479_v28  ;;  %v1583_v16 = vand.u32 127, %v241_v12 }
  0xdf   : > { %v245_v12 = vcvt.s32.f32 %v1583_v16 }
  0xe2   : > { %v321_v61 = vpop.permute.xlu1 %320  ;;  %v487_v62 = vld [vmem:[#allocation2 + $0x70] sm:$0xf] }
  0xe3   : > { %v326_v2 = vsel %vm324_vm7, %v321_v61, %v323_v48  ;;  %v458_v3 = vpop.permute.xlu0 %457  ;;  %v496_v4 = vpack.c.bf16 %v487_v62, %v487_v62 }
  0xe4   : > { %331 = vst [vmem:[#allocation2 + $0x20] sm:$0xf] %v326_v2  ;;  %v462_v5 = vsel %vm461_vm8, %v456_v59, %v458_v3  ;;  %v463_v6 = vsel %vm461_vm8, %v458_v3, %v460_v58 }
  0xe5   : > { %467 = vst [vmem:[#allocation2 + $0x60] sm:$0xf] %v462_v5  ;;  %v538_v7 = vsel %vm1782_vm9, %v496_v4, 0 }
  0xe6   : > { %468 = vst [vmem:[#allocation2 + $0x68] sm:$0xf] %v463_v6  ;;  %581 = vmatpush.bf16.msra.mxu2 %v538_v7 }
  0xea   : > { %582 = vmatpush.bf16.msra.mxu2 %v493_v11  ;;  %v347_v13 = vpop.permute.xlu1 %346 }
  0xeb   : > { %v352_v14 = vsel %vm1781_vm10, %v347_v13, %v349_v53  ;;  %v319_v15 = vpop.permute.xlu0 %318 }
  0xec   : > { %357 = vst [vmem:[#allocation2 + $0x20] sm:$0xf0] %v352_v14  ;;  %v325_v17 = vsel %vm324_vm7, %v319_v15, %v321_v61  ;;  %v485_v19 = vld [vmem:[#allocation2 + $0x60] sm:$0xf] }
  0xed   : > { %330 = vst [vmem:[#allocation2 + $0x18] sm:$0xf] %v325_v17  ;;  %v494_v20 = vpack.c.bf16 %v485_v19, %v485_v19  ;;  %v486_v21 = vld [vmem:[#allocation2 + $0x68] sm:$0xf]  ;;  %v244_v19 = vadd.s32 256, %v1583_v16 }
  0xee   : > { %583 = vmatpush.bf16.msra.mxu2 %v490_v18  ;;  %v495_v23 = vpack.c.bf16 %v486_v21, %v486_v21 }
  0xef   : > { %v532_v24 = vsel %vm1782_vm9, %v494_v20, 0  ;;  %v247_v27 = vcvt.s32.f32 %v244_v19 }
  0xf0   : > { %545 = vmatpush.bf16.msra.mxu0 %v532_v24  ;;  %v535_v26 = vsel %vm1782_vm9, %v495_v23, 0 }
  0xf1   : > { %563 = vmatpush.bf16.msra.mxu1 %v535_v26  ;;  %1178 = vmatmul.msk.bf16.vlgmr.msra.gmra.mxu2 %vm1780_vm11, %v1186_v22 }
  0xf3   : > { %v345_v32 = vpop.permute.xlu0 %344  ;;  %v477_v34 = vld [vmem:[#allocation2 + $0x20] sm:$0xff] }
  0xf4   : > { %v351_v35 = vsel %vm1781_vm10, %v345_v32, %v347_v13  ;;  %546 = vmatpush.bf16.msra.mxu0 %v491_v29  ;;  %v489_v37 = vpack.c.bf16 %v477_v34, %v474_v36  ;;  %v250_v34 = vadd.f32 0.5, %v247_v27 }
  0xf5   : > { %356 = vst [vmem:[#allocation2 + $0x18] sm:$0xf0] %v351_v35  ;;  %564 = vmatpush.bf16.msra.mxu1 %v492_v33 }
  0xf9   : > { %565 = vmatpush.bf16.msra.mxu1 %v489_v37 }
  0xfb   : > { %v503_v44 = vpop.permute.xlu0 %502 }
  0xfc   : > { %1176 = vmatmul.msk.bf16.vlgmr.msra.gmra.mxu1 %vm1780_vm11, %v1186_v22  ;;  %v476_v41 = vld [vmem:[#allocation2 + $0x18] sm:$0xff] }
  0xfd   : > { %v488_v42 = vpack.c.bf16 %v476_v41, %v473_v40  ;;  %v1606_v40 = vadd.s32 128, %v1583_v16 }
  0xff   : > { %547 = vmatpush.bf16.msra.mxu0 %v488_v42 }
 0x101   : > { %1179 = vmatmul.msk.bf16.gmra.mxu2 %vm1780_vm11, %v522_v43 }
 0x102   : > { %1174 = vmatmul.msk.bf16.vlgmr.msra.gmra.mxu0 %vm1780_vm11, %v1186_v22 }
 0x10c   : > { %1177 = vmatmul.msk.bf16.gmra.mxu1 %vm1780_vm11, %v522_v43 }
 0x112   : > { %1175 = vmatmul.msk.bf16.gmra.mxu0 %vm1780_vm11, %v522_v43 }
 0x174   : > { %v585_v45 = vpop.f32.mrf.mxu2 }
 0x175   : > { %v1565_v46 = vadd.f32 %v585_v45, %v503_v44 }
 0x177   : > { %v609_v47 = vsel %vm287_vm0, %v1565_v46, -inf }
 0x178   : > { %v610_v48 = vrot.slane %v609_v47, 4 }
 0x179   : > { %v567_v49 = vpop.f32.mrf.mxu1 }
 0x17a   : > { %v611_v50 = vmax.f32 %v609_v47, %v610_v48  ;;  %v1569_v51 = vadd.f32 %v567_v49, %v503_v44 }
 0x17c   : > { %v612_v52 = vrot.slane %v611_v50, 2  ;;  %v602_v53 = vsel %vm1779_vm12, %v1569_v51, -inf  ;;  %v1579_v11 = vpop.f32.mrf.mxu2 }
 0x17d   : > { %v603_v54 = vrot.slane %v602_v53, 4 }
 0x17e   : > { %v613_v55 = vmax.f32 %v611_v50, %v612_v52  ;;  %v246_v52 = vcvt.s32.f32 %v1606_v40 }
 0x17f   : > { %v604_v56 = vmax.f32 %v602_v53, %v603_v54  ;;  %v549_v57 = vpop.f32.mrf.mxu0 }
 0x180   : > { %v614_v58 = vrot.slane %v613_v55, 1  ;;  %v1573_v59 = vadd.f32 %v549_v57, %v503_v44  ;;  %v253_v44 = vmul.f32 0.055555556, %v250_v34  ;;  %v249_v57 = vadd.f32 0.5, %v246_v52 }
 0x181   : > { %v605_v60 = vrot.slane %v604_v56, 2  ;;  %v1581_v15 = vpop.f32.mrf.mxu1 }
 0x182   : > { %v615_v61 = vmax.f32 %v613_v55, %v614_v58  ;;  %v595_v62 = vsel %vm1779_vm12, %v1573_v59, -inf  ;;  %v256_v53 = vfloor.f32 %v253_v44 }
 0x183   : > { %v606_v63 = vmax.f32 %v604_v56, %v605_v60  ;;  %v596_v0 = vrot.slane %v595_v62, 4 }
 0x184   : > { %v618_v2 = vsub.f32 %v1565_v46, %v615_v61  ;;  %v1593_v25 = vpop.f32.mrf.mxu2  ;;  %v259_v61 = vmul.f32 18.0, %v256_v53 }
 0x185   : > { %v607_v3 = vrot.slane %v606_v63, 1  ;;  %v597_v4 = vmax.f32 %v595_v62, %v596_v0 }
 0x186   : > { %v623_v5 = vmul.f32 1.442695, %v618_v2  ;;  %v252_v2 = vmul.f32 0.055555556, %v249_v57 }
 0x187   : > { %v608_v6 = vmax.f32 %v606_v63, %v607_v3  ;;  %v598_v7 = vrot.slane %v597_v4, 2  ;;  %v1591_v22 = vpop.f32.mrf.mxu0 }
 0x188   : > { %1256 = vpow2.f32 %v623_v5  ;;  %v255_v19 = vfloor.f32 %v252_v2 }
 0x189   : > { %v617_v9 = vsub.f32 %v1569_v51, %v608_v6  ;;  %v599_v10 = vmax.f32 %v597_v4, %v598_v7  ;;  %v1599_v31 = vpop.f32.mrf.mxu1  ;;  %v1615_v4 = vpop.permute.xlu1 %507  ;;  %v262_v6 = vsub.f32 %v247_v27, %v259_v61  ;;  %v248_v27 = vadd.f32 0.5, %v245_v12 }
 0x18a   : > { %v552_v40 = vadd.f32 %v1591_v22, %v1615_v4 }
 0x18b   : > { %v621_v13 = vmul.f32 1.442695, %v617_v9  ;;  %v600_v14 = vrot.slane %v599_v10, 1 }
 0x18c   : > { %v592_v41 = vpop.f32.mrf.mxu2 }
 0x18d   : > { %1258 = vpow2.f32 %v621_v13  ;;  %v601_v17 = vmax.f32 %v599_v10, %v600_v14  ;;  %v1621_v14 = vadd.f32 %v1581_v15, %v1615_v4  ;;  %v1378_v41 = vmov 0.0  }
 0x18e   : > { %v1585_v18 = vpop.eup %1256 }
 0x18f   : > { %v639_v20 = vsel %vm287_vm0, %v1585_v18, 0.0  ;;  %v616_v21 = vsub.f32 %v1573_v59, %v601_v17  ;;  %v1601_v36 = vpop.f32.mrf.mxu0 }
 0x190   : > { %v640_v23 = vrot.slane %v639_v20, 4 }
 0x191   : > { %v619_v24 = vmul.f32 1.442695, %v616_v21  ;;  %v574_v48 = vpop.f32.mrf.mxu1 }
 0x192   : > { %v641_v26 = vadd.f32 %v640_v23, %v639_v20  ;;  %v1623_v23 = vpop.permute.xlu2 %512  ;;  %v251_v48 = vmul.f32 0.055555556, %v248_v27 }
 0x193   : > { %v1595_v28 = vpop.eup %1258  ;;  %1260 = vpow2.f32 %v619_v24  ;;  %v591_v34 = vadd.f32 %v1593_v25, %v1623_v23 }
 0x194   : > { %v642_v29 = vrot.slane %v641_v26, 2  ;;  %v632_v30 = vsel %vm1779_vm12, %v1595_v28, 0.0 }
 0x195   : > { %v633_v32 = vrot.slane %v632_v30, 4 }
 0x196   : > { %v643_v33 = vadd.f32 %v642_v29, %v641_v26 }
 0x197   : > { %v634_v35 = vadd.f32 %v633_v32, %v632_v30  ;;  %v556_v56 = vpop.f32.mrf.mxu0  ;;  %v588_v32 = vadd.f32 %v1579_v11, %v1615_v4 }
 0x198   : > { %v644_v37 = vrot.slane %v643_v33, 1 }
 0x199   : > { %v1603_v38 = vpop.eup %1260  ;;  %v635_v39 = vrot.slane %v634_v35, 2 }
 0x19a   : > { %v645_v42 = vadd.f32 %v644_v37, %v643_v33  ;;  %v625_v43 = vsel %vm1779_vm12, %v1603_v38, 0.0  ;;  %vm265_vm12 = vcmp.lt.f32.partialorder %v262_v6, 16.0 }
 0x19b   : > { %v636_v45 = vadd.f32 %v635_v39, %v634_v35  ;;  %v626_v47 = vrot.slane %v625_v43, 4  ;;  %v573_v35 = vadd.f32 %v1599_v31, %v1623_v23 }
 0x19c   : > { %1262 = vrcp.f32 %v645_v42  ;;  %v685_v5 = vand.u32 2147483648, %v645_v42  ;;  %v683_v10 = vand.u32 2147483647, %v645_v42  ;;  %vm679_vm14 = vweird.f32 %v645_v42 }
 0x19d   : > { %v637_v49 = vrot.slane %v636_v45, 1  ;;  %v627_v50 = vadd.f32 %v626_v47, %v625_v43  ;;  %v258_v43 = vmul.f32 18.0, %v255_v19 }
 0x19e   : > { %v686_v21 = vor.u32 1.1754944e-38, %v685_v5  ;;  %vm684_vm11 = vcmp.eq.f32.partialorder %v683_v10, 8.507059e+37 }
 0x19f   : > { %v638_v54 = vadd.f32 %v637_v49, %v636_v45  ;;  %v628_v55 = vrot.slane %v627_v50, 2 }
 0x1a1   : > { %1264 = vrcp.f32 %v638_v54  ;;  %v629_v60 = vadd.f32 %v628_v55, %v627_v50  ;;  %v671_v24 = vand.u32 2147483648, %v638_v54  ;;  %v669_v30 = vand.u32 2147483647, %v638_v54 }
 0x1a2   : > { %v1263_v58 = vpop.eup %1262 }
 0x1a3   : > { %v675_v62 = vmul.f32 %v1263_v58, %v645_v42  ;;  %v630_v63 = vrot.slane %v629_v60, 1  ;;  %vm680_vm13 = vweird.f32 %v1263_v58  ;;  %v1169_v42 = vsel %vm265_vm12, 1.0, %v1378_v41 }
 0x1a4   : > { %vm681_vm15 = vmor %vm679_vm14, %vm680_vm13  ;;  %vm665_vm13 = vweird.f32 %v638_v54  ;;  %v672_v44 = vor.u32 1.1754944e-38, %v671_v24  ;;  %vm670_vm14 = vcmp.eq.f32.partialorder %v669_v30, 8.507059e+37 }
 0x1a5   : > { %v676_v0 = vsub.f32 1.0, %v675_v62  ;;  %v1613_v3 = vadd.f32 %v630_v63, %v629_v60 }
 0x1a7   : > { %v1265_v7 = vpop.eup %1264  ;;  %v677_v9 = vmul.f32 %v1263_v58, %v676_v0  ;;  %1266 = vrcp.f32 %v1613_v3  ;;  %v655_v55 = vand.u32 2147483647, %v1613_v3  ;;  %v657_v56 = vand.u32 2147483648, %v1613_v3 }
 0x1a8   : > { %v661_v13 = vmul.f32 %v1265_v7, %v638_v54  ;;  %vm666_vm10 = vweird.f32 %v1265_v7  ;;  %v254_v0 = vfloor.f32 %v251_v48 }
 0x1a9   : > { %v678_v17 = vadd.f32 %v1263_v58, %v677_v9 }
 0x1aa   : > { %v662_v20 = vsub.f32 1.0, %v661_v13 }
 0x1ab   : > { %v682_v26 = vsel %vm681_vm15, %v1263_v58, %v678_v17 }
 0x1ac   : > { %v663_v29 = vmul.f32 %v1265_v7, %v662_v20  ;;  %v687_v15 = vsel %vm684_vm11, %v686_v21, %v682_v26  ;;  %vm667_vm11 = vmor %vm665_vm13, %vm666_vm10  ;;  %vm651_vm10 = vweird.f32 %v1613_v3  ;;  %vm656_vm13 = vcmp.eq.f32.partialorder %v655_v55, 8.507059e+37 }
 0x1ad   : > { %v690_v33 = vmul.f32 %v1585_v18, %v687_v15  ;;  %v1267_v37 = vpop.eup %1266 }
 0x1ae   : > { %v664_v39 = vadd.f32 %v1265_v7, %v663_v29  ;;  %v647_v11 = vmul.f32 %v1267_v37, %v1613_v3  ;;  %vm652_vm15 = vweird.f32 %v1267_v37  ;;  %v257_v29 = vmul.f32 18.0, %v254_v0 }
 0x1af   : > { %v693_v45 = vperm.slane %v690_v33, 0  ;;  %v699_v18 = vperm.slane %v690_v33, 1  ;;  %v726_v25 = vperm.slane %v690_v33, 3  ;;  %v717_v53 = vperm.slane %v690_v33, 2  ;;  %vm653_vm12 = vmor %vm651_vm10, %vm652_vm15 }
 0x1b0   : > { %v668_v47 = vsel %vm667_vm11, %v1265_v7, %v664_v39  ;;  %v648_v31 = vsub.f32 1.0, %v647_v11  ;;  %vm745_vm15 = vcmask 150528   ;;  %vm747_vm10 = vcmask 699800  }
 0x1b1   : > { %v673_v49 = vsel %vm670_vm14, %v672_v44, %v668_v47  ;;  %v702_v50 = vmul.f32 %v699_v18, %v588_v32  ;;  %v696_v58 = vmul.f32 %v693_v45, %v1565_v46  ;;  %v729_v61 = vmul.f32 %v726_v25, %v591_v34  ;;  %746 = vst.msk [vmem:[#allocation4] sm:$0xf] %vm745_vm15, %v1378_v41 }
 0x1b2   : > { %v689_v54 = vmul.f32 %v1595_v28, %v673_v49  ;;  %v649_v57 = vmul.f32 %v1267_v37, %v648_v31  ;;  %v720_v6 = vmul.f32 %v717_v53, %v588_v32  ;;  %v658_v28 = vor.u32 1.1754944e-38, %v657_v56  ;;  %748 = vst.msk [vmem:[#allocation4 + $0x8] sm:$0xf] %vm747_vm10, %v1378_v41 }
 0x1b3   : > { %v708_v60 = vrot.slane %v702_v50, 4  ;;  %v261_v46 = vsub.f32 %v246_v52, %v258_v43  ;;  %v735_v19 = vrot.slane %v729_v61, 4 }
 0x1b4   : > { %v692_v62 = vperm.slane %v689_v54, 0  ;;  %v698_v63 = vperm.slane %v689_v54, 1  ;;  %v650_v2 = vadd.f32 %v1267_v37, %v649_v57  ;;  %v725_v7 = vperm.slane %v689_v54, 3 }
 0x1b5   : > { %v714_v5 = vadd.f32 %v708_v60, %v696_v58  ;;  %v716_v10 = vperm.slane %v689_v54, 2  ;;  %vm264_vm11 = vcmp.lt.f32.partialorder %v261_v46, 16.0 }
 0x1b6   : > { %v701_v9 = vmul.f32 %v698_v63, %v1621_v14  ;;  %v654_v13 = vsel %vm653_vm12, %v1267_v37, %v650_v2  ;;  %v695_v3 = vmul.f32 %v692_v62, %v1569_v51  ;;  %v728_v24 = vmul.f32 %v725_v7, %v573_v35 }
 0x1b7   : > { %v723_v17 = vadd.f32 %v720_v6, %v714_v5  ;;  %v659_v20 = vsel %vm656_vm13, %v658_v28, %v654_v13  ;;  %v719_v15 = vmul.f32 %v716_v10, %v1621_v14  ;;  %v555_v51 = vadd.f32 %v1601_v36, %v1623_v23 }
 0x1b8   : > { %v707_v21 = vrot.slane %v701_v9, 4  ;;  %v688_v26 = vmul.f32 %v1603_v38, %v659_v20  ;;  %v734_v37 = vrot.slane %v728_v24, 4  ;;  %v1168_v43 = vsel %vm264_vm11, 1.0, %v1378_v41 }
 0x1b9   : > { %v741_v27 = vadd.f32 %v735_v19, %v723_v17  ;;  %v260_v14 = vsub.f32 %v245_v12, %v257_v29  ;;  %vm769_vm12 = vcmask 1043608   ;;  %vm770_vm13 = vcmask 1047556  }
 0x1ba   : > { %v713_v30 = vadd.f32 %v707_v21, %v695_v3  ;;  %v691_v52 = vperm.slane %v688_v26, 0  ;;  %v697_v32 = vperm.slane %v688_v26, 1  ;;  %v724_v35 = vperm.slane %v688_v26, 3  ;;  %vm771_vm9 = vmor %vm770_vm13, %vm769_vm12 }
 0x1bb   : > { %v744_v33 = vmul.f32 %v1169_v42, %v741_v27  ;;  %v715_v38 = vperm.slane %v688_v26, 2  ;;  %vm263_vm14 = vcmp.lt.f32.partialorder %v260_v14, 16.0  ;;  %vm764_vm11 = vcmask 154624  }
 0x1bc   : > { %v722_v34 = vadd.f32 %v719_v15, %v713_v30  ;;  %v700_v39 = vmul.f32 %v697_v32, %v552_v40  ;;  %v694_v22 = vmul.f32 %v691_v52, %v1573_v59  ;;  %v727_v11 = vmul.f32 %v724_v35, %v555_v51 }
 0x1bd   : > { %754 = vst.sshfl [vmem:[#allocation1 + $0x10] sm:$0xff pattern:$0x75316420] %v744_v33  ;;  %v718_v18 = vmul.f32 %v715_v38, %v552_v40  ;;  %v1167_v47 = vsel %vm263_vm14, 1.0, %v1378_v41  ;;  %vm773_vm14 = vcmask 412672  }
 0x1be   : > { %v740_v44 = vadd.f32 %v734_v37, %v722_v34  ;;  %v706_v4 = vrot.slane %v700_v39, 4  ;;  %v733_v23 = vrot.slane %v727_v11, 4 }
 0x1c0   : > { %v743_v42 = vmul.f32 %v1168_v43, %v740_v44  ;;  %v712_v45 = vadd.f32 %v706_v4, %v694_v22 }
 0x1c2   : > { %753 = vst.sshfl [vmem:[#allocation1 + $0x8] sm:$0xff pattern:$0x75316420] %v743_v42  ;;  %v721_v36 = vadd.f32 %v718_v18, %v712_v45 }
 0x1c4   : > { %v758_v25 = vld [vmem:[#allocation1 + $0x11] ss:$2 sm:$0xff]  ;;  %v739_v48 = vadd.f32 %v733_v23, %v721_v36 }
 0x1c5   : > { %761 = vrot.lane.b32.xlu2 %v758_v25, %s1379_s15 }
 0x1c6   : > { %v742_v16 = vmul.f32 %v1167_v47, %v739_v48 }
 0x1c8   : > { %752 = vst.sshfl [vmem:[#allocation1] sm:$0xff pattern:$0x75316420] %v742_v16 }
 0x1cf   : > { %v756_v12 = vld [vmem:[#allocation1 + $0x1] ss:$2 sm:$0xff] }
 0x1d0   : > { %759 = vrot.lane.b32.xlu1 %v756_v12, %s1379_s15 }
 0x21f   : > { %v762_v31 = vpop.permute.xlu2 %761 }
 0x242   : > { %v760_v59 = vpop.permute.xlu1 %759 }
 0x243   : > { %v763_v49 = vrot.slane %v760_v59, 4 }
 0x245   : > { %v765_v50 = vsel %vm764_vm11, %v763_v49, %v760_v59  ;;  %v766_v53 = vsel %vm764_vm11, %v763_v49, %v762_v31 }
 0x246   : > { %772 = vst.msk [vmem:[#allocation4] sm:$0xff] %vm771_vm9, %v765_v50  ;;  %vm1785_vm9 = vcmask 1041408  }
 0x247   : > { %774 = vst.msk [vmem:[#allocation4 + $0x8] sm:$0xf] %vm773_vm14, %v766_v53 }
 0x24d   : > { %v775_v54 = vld [vmem:[#allocation4] sm:$0xff] }
 0x24e   : > { %v776_v55 = vld [vmem:[#allocation4 + $0x8] sm:$0xf]  ;;  %779 = vst [vmem:[#allocation1] ss:$2 sm:$0xff] %v775_v54 }
 0x24f   : > { %781 = vst [vmem:[#allocation1 + $0x10] ss:$2 sm:$0xff] %v776_v55  ;;  %v833_v62 = vld [vmem:[#allocation4 + $0x8] sm:$0xf] }
 0x250   : > { %v899_v46 = vld [vmem:[#allocation4 + $0x8] sm:$0xf] }
 0x255   : > { %v782_v56 = vld.sshfl [vmem:[#allocation1] sm:$0xff pattern:$0x75316420]  ;;  %v783_v57 = vld.sshfl [vmem:[#allocation1 + $0x8] sm:$0xff pattern:$0x75316420] }
 0x256   : > { %v784_v58 = vld.sshfl [vmem:[#allocation1 + $0x10] sm:$0xff pattern:$0x75316420]  ;;  %792 = vst [vmem:[#allocation1 + $0x1] ss:$2 sm:$0xff] %v775_v54 }
 0x257   : > { %794 = vst [vmem:[#allocation1 + $0x11] ss:$2 sm:$0xff] %v776_v55 }
 0x258   : > { %788 = vst [vmem:[#allocation3] sm:$0xf] %v782_v56 }
 0x259   : > { %789 = vst [vmem:[#allocation3 + $0x8] sm:$0xf] %v783_v57 }
 0x25a   : > { %790 = vst.msk [vmem:[#allocation3 + $0x10] sm:$0xf] %vm287_vm0, %v784_v58 }
 0x25d   : > { %v796_v41 = vld.sshfl [vmem:[#allocation1 + $0x8] sm:$0xff pattern:$0x75316420]  ;;  %v795_v60 = vld.sshfl [vmem:[#allocation1] sm:$0xff pattern:$0x75316420] }
 0x25e   : > { %v1661_v61 = vld.sshfl [vmem:[#allocation1 + $0x10] sm:$0xff pattern:$0x75316420]  ;;  %800 = vrot.lane.b32.xlu2 %v796_v41, %s1369_s17  ;;  %798 = vrot.lane.b32.xlu1 %v795_v60, %s1369_s17  ;;  %812 = vst [vmem:[#allocation1] ss:$2 sm:$0xff] %v775_v54 }
 0x25f   : > { %814 = vst [vmem:[#allocation1 + $0x10] ss:$2 sm:$0xff] %v776_v55 }
 0x265   : > { %v815_v63 = vld.sshfl [vmem:[#allocation1] sm:$0xff pattern:$0x75316420]  ;;  %v816_v0 = vld.sshfl [vmem:[#allocation1 + $0x8] sm:$0xff pattern:$0x75316420] }
 0x266   : > { %837 = vst [vmem:[#allocation1 + $0x1] ss:$2 sm:$0xff] %v775_v54  ;;  %v817_v2 = vld.sshfl [vmem:[#allocation1 + $0x10] sm:$0xff pattern:$0x75316420] }
 0x267   : > { %839 = vst [vmem:[#allocation1 + $0x11] ss:$2 sm:$0xff] %v833_v62 }
 0x26d   : > { %v840_v5 = vld.sshfl [vmem:[#allocation1] sm:$0xff pattern:$0x75316420]  ;;  %v841_v6 = vld.sshfl [vmem:[#allocation1 + $0x8] sm:$0xff pattern:$0x75316420] }
 0x26e   : > { %857 = vst [vmem:[#allocation1] ss:$2 sm:$0xff] %v775_v54  ;;  %v842_v7 = vld.sshfl [vmem:[#allocation1 + $0x10] sm:$0xff pattern:$0x75316420] }
 0x26f   : > { %859 = vst [vmem:[#allocation1 + $0x10] ss:$2 sm:$0xff] %v833_v62 }
 0x275   : > { %v861_v28 = vld.sshfl [vmem:[#allocation1 + $0x8] sm:$0xff pattern:$0x75316420]  ;;  %v860_v9 = vld.sshfl [vmem:[#allocation1] sm:$0xff pattern:$0x75316420] }
 0x276   : > { %865 = vrot.lane.b32.xlu0 %v861_v28, %s1370_s23  ;;  %863 = vrot.lane.b32.xlu2 %v860_v9, %s1370_s23  ;;  %878 = vst [vmem:[#allocation1 + $0x1] ss:$2 sm:$0xff] %v775_v54  ;;  %v862_v10 = vld.sshfl [vmem:[#allocation1 + $0x10] sm:$0xff pattern:$0x75316420] }
 0x277   : > { %880 = vst [vmem:[#allocation1 + $0x11] ss:$2 sm:$0xff] %v833_v62 }
 0x27d   : > { %v882_v13 = vld.sshfl [vmem:[#allocation1 + $0x8] sm:$0xff pattern:$0x75316420]  ;;  %v881_v17 = vld.sshfl [vmem:[#allocation1] sm:$0xff pattern:$0x75316420] }
 0x27e   : > { %886 = vrot.lane.b32.xlu2 %v882_v13, %s1371_s25  ;;  %884 = vrot.lane.b32.xlu1 %v881_v17, %s1371_s25  ;;  %902 = vst [vmem:[#allocation1] ss:$2 sm:$0xff] %v775_v54  ;;  %v883_v19 = vld.sshfl [vmem:[#allocation1 + $0x10] sm:$0xff pattern:$0x75316420] }
 0x27f   : > { %904 = vst [vmem:[#allocation1 + $0x10] ss:$2 sm:$0xff] %v899_v46 }
 0x285   : > { %v906_v3 = vld.sshfl [vmem:[#allocation1 + $0x8] sm:$0xff pattern:$0x75316420]  ;;  %v905_v20 = vld.sshfl [vmem:[#allocation1] sm:$0xff pattern:$0x75316420] }
 0x286   : > { %910 = vrot.lane.b32.xlu1 %v906_v3, %s1372_s26  ;;  %908 = vrot.lane.b32.xlu0 %v905_v20, %s1372_s26  ;;  %923 = vst [vmem:[#allocation1 + $0x1] ss:$2 sm:$0xff] %v775_v54  ;;  %v907_v21 = vld.sshfl [vmem:[#allocation1 + $0x10] sm:$0xff pattern:$0x75316420] }
 0x287   : > { %925 = vst [vmem:[#allocation1 + $0x11] ss:$2 sm:$0xff] %v899_v46  ;;  %v963_v3 = vld [vmem:[%s1776_s3] sm:$0x3] }
 0x28d   : > { %v927_v24 = vld.sshfl [vmem:[#allocation1 + $0x8] sm:$0xff pattern:$0x75316420]  ;;  %v926_v26 = vld.sshfl [vmem:[#allocation1] sm:$0xff pattern:$0x75316420] }
 0x28e   : > { %931 = vrot.lane.b32.xlu0 %v927_v24, %s1373_s30  ;;  %929 = vrot.lane.b32.xlu2 %v926_v26, %s1373_s30  ;;  %943 = vst [vmem:[#allocation1] ss:$2 sm:$0xff] %v775_v54  ;;  %v928_v27 = vld.sshfl [vmem:[#allocation1 + $0x10] sm:$0xff pattern:$0x75316420] }
 0x28f   : > { %945 = vst [vmem:[#allocation1 + $0x10] ss:$2 sm:$0xff] %v899_v46 }
 0x295   : > { %v947_v29 = vld.sshfl [vmem:[#allocation1 + $0x8] sm:$0xff pattern:$0x75316420]  ;;  %v946_v30 = vld.sshfl [vmem:[#allocation1] sm:$0xff pattern:$0x75316420] }
 0x296   : > { %843 = vrot.lane.b32.xlu2 %v840_v5, %s1376_s8  ;;  %951 = vrot.lane.b32.xlu1 %v947_v29, %s1374_s6  ;;  %1045 = vst [vmem:[#allocation1] ss:$2 sm:$0xff] %v1477_v1  ;;  %v948_v15 = vld.sshfl [vmem:[#allocation1 + $0x10] sm:$0xff pattern:$0x75316420] }
 0x297   : > { %949 = vrot.lane.b32.xlu0 %v946_v30, %s1374_s6  ;;  %1047 = vst [vmem:[#allocation1 + $0x10] ss:$2 sm:$0xff] %v1488_v8  ;;  %v988_v8 = vld [vmem:[%s1777_s4] sm:$0xf] }
 0x29d   : > { %v1049_v40 = vld.sshfl [vmem:[#allocation1 + $0x8] sm:$0xff pattern:$0x75316420]  ;;  %v1048_v52 = vld.sshfl [vmem:[#allocation1] sm:$0xff pattern:$0x75316420] }
 0x29e   : > { %867 = vrot.lane.b32.xlu2 %v862_v10, %s1370_s23  ;;  %820 = vrot.lane.b32.xlu1 %v816_v0, %s1375_s7  ;;  %v1050_v1 = vld.sshfl [vmem:[#allocation1 + $0x10] sm:$0xff pattern:$0x75316420] }
 0x29f   : > { %818 = vrot.lane.b32.xlu0 %v815_v63, %s1375_s7 }
 0x2a6   : > { %933 = vrot.lane.b32.xlu2 %v928_v27, %s1373_s30  ;;  %953 = vrot.lane.b32.xlu1 %v948_v15, %s1374_s6  ;;  %s1189_s6 = smul.u32 12, %s1431_s22  ;;  %s1318_s30 = scalar_lea.hbm %s1778_s5, 24 }
 0x2a7   : > { %845 = vrot.lane.b32.xlu0 %v841_v6, %s1376_s8 }
 0x2a8   : > { %s1084_s10 = scalar_lea.hbm %s1778_s5, %s1189_s6 }
 0x2a9   : > { %s1088_s11 = sshll.u32 %s1084_s10, 4  ;;  %s1089_s11 = int_to_ptr.hbm [resolvable:$true] %s1088_s11 }
 0x2aa   : > { %s1312_s13 = sshra.s32 %s1089_s11, 4  ;;  %s1313_s13 = int_to_ptr.hbm [resolvable:$true] %s1312_s13 }
 0x2ab   : > { %s1314_s14 = scalar_lea.hbm %s1313_s13, 12  ;;  %p1319_p3 = scmp.lt.s32.totalorder %s1313_s13, %s1778_s5 }
 0x2ac   : > { %p1315_p0 = scmp.ne.s32.totalorder %s1313_s13, %s1314_s14  ;;  %p1320_p4 = scmp.lt.s32.totalorder %s1318_s30, %s1314_s14 }
 0x2ae   : > { %847 = vrot.lane.b32.xlu2 %v842_v7, %s1376_s8  ;;  %912 = vrot.lane.b32.xlu1 %v907_v21, %s1372_s26  ;;  %p1316_p1 = pnand %p1315_p0, %p1448_p5  ;;  %p1321_p7 = por %p1320_p4, %p1319_p3 }
 0x2af   : > { %888 = vrot.lane.b32.xlu0 %v883_v19, %s1371_s25  ;;  %s232_s25 = sand.u32 1, %s1356_s19  }
 0x2b0   : > { %s1187_s26 = smul.u32 12, %s232_s25  ;;  %s1073_s12 = scalar_lea.sflag [#allocation7], %s232_s25 }
 0x2b1   : > { %p1317_p2 = pneg %p1316_p1 }
 0x2b3   : > { %p1322_p8 = pnand %p1321_p7, %p1317_p2 }
 0x2b6   : > { %1055 = vrot.lane.b32.xlu2 %v1050_v1, %s1370_s23  ;;  %822 = vrot.lane.b32.xlu1 %v817_v2, %s1375_s7  ;;  %s234_s7 = scalar_lea.vmem [#allocation8], %s1187_s26 }
 0x2b7   : > { %802 = vrot.lane.b32.xlu0 %v1661_v61, %s1369_s17  ;;  %s1086_s22 = sshll.u32 %s234_s7, 4  ;;  %s1087_s22 = int_to_ptr.vmem [resolvable:$true] %s1086_s22 }
 0x2b8   : > { %v1696_v32 = vpop.permute.xlu2 %800 }
 0x2be   : > { %1053 = vrot.lane.b32.xlu1 %v1049_v40, %s1370_s23 }
 0x2bf   : > { %991 = vperm.xlu0 %1253, %v988_v8  }
 0x2c7   : > { %1051 = vrot.lane.b32.xlu0 %v1048_v52, %s1370_s23 }
 0x2d0   : > { %v799_v33 = vpop.permute.xlu1 %798  ;;  %v864_v34 = vpop.permute.xlu2 %863 }
 0x2d1   : > { %v804_v51 = vsel %vm302_vm2, %v799_v33, %v1696_v32 }
 0x2d2   : > { %809 = vst [vmem:[#allocation3] sm:$0xf0] %v804_v51 }
 0x2d8   : > { %v887_v37 = vpop.permute.xlu2 %886 }
 0x2d9   : > { %v964_v9 = vld [vmem:[#allocation3] sm:$0xff] }
 0x2e8   : > { %v866_v35 = vpop.permute.xlu0 %865  ;;  %v930_v39 = vpop.permute.xlu2 %929 }
 0x2e9   : > { %v869_v38 = vsel %vm371_vm3, %v864_v34, %v866_v35 }
 0x2ea   : > { %874 = vst [vmem:[#allocation3 + $0x30] sm:$0xf] %v869_v38 }
 0x2f0   : > { %v885_v43 = vpop.permute.xlu1 %884  ;;  %v844_v14 = vpop.permute.xlu2 %843 }
 0x2f1   : > { %v890_v44 = vsel %vm393_vm4, %v885_v43, %v887_v37 }
 0x2f2   : > { %895 = vst [vmem:[#allocation3 + $0x30] sm:$0xf0] %v890_v44 }
 0x2f8   : > { %v911_v22 = vpop.permute.xlu1 %910  ;;  %v909_v4 = vpop.permute.xlu0 %908 }
 0x2f9   : > { %v914_v11 = vsel %vm418_vm5, %v909_v4, %v911_v22  ;;  %v868_v42 = vpop.permute.xlu2 %867  ;;  %v970_v56 = vld [vmem:[#allocation3 + $0x30] sm:$0xff] }
 0x2fa   : > { %919 = vst [vmem:[#allocation3 + $0x48] sm:$0xf] %v914_v11  ;;  %v870_v45 = vsel %vm371_vm3, %v866_v35, %v868_v42 }
 0x2fb   : > { %875 = vst [vmem:[#allocation3 + $0x38] sm:$0xf] %v870_v45 }
 0x2fc   : > { %876 = vst.msk [vmem:[#allocation3 + $0x40] sm:$0xf] %vm287_vm0, %v868_v42 }
 0x300   : > { %v932_v18 = vpop.permute.xlu0 %931 }
 0x301   : > { %v935_v36 = vsel %vm440_vm6, %v930_v39, %v932_v18  ;;  %v934_v23 = vpop.permute.xlu2 %933 }
 0x302   : > { %940 = vst [vmem:[#allocation3 + $0x48] sm:$0xf0] %v935_v36  ;;  %v936_v47 = vsel %vm440_vm6, %v932_v18, %v934_v23  ;;  %vm1786_vm6 = vcmask 900096  }
 0x303   : > { %941 = vst [vmem:[#allocation3 + $0x50] sm:$0xf0] %v936_v47  ;;  %vm1787_vm15 = vmmov %vm1786_vm6 }
 0x304   : > { %942 = vst.msk [vmem:[#allocation3 + $0x58] sm:$0xf0] %vm310_vm1, %v934_v23 }
 0x308   : > { %v952_v25 = vpop.permute.xlu1 %951 }
 0x309   : > { %v848_v48 = vpop.permute.xlu2 %847  ;;  %v950_v16 = vpop.permute.xlu0 %949  ;;  %v973_v55 = vld [vmem:[#allocation3 + $0x48] sm:$0xff] }
 0x30a   : > { %856 = vst.msk [vmem:[#allocation3 + $0x28] sm:$0xf0] %vm310_vm1, %v848_v48  ;;  %v955_v12 = vsel %vm461_vm8, %v950_v16, %v952_v25  ;;  %v982_v58 = vpack.c.bf16 %v973_v55, %v970_v56 }
 0x30b   : > { %960 = vst [vmem:[#allocation3 + $0x60] sm:$0xf] %v955_v12 }
 0x310   : > { %v821_v59 = vpop.permute.xlu1 %820 }
 0x311   : > { %v819_v49 = vpop.permute.xlu0 %818 }
 0x312   : > { %v824_v31 = vsel %vm324_vm7, %v819_v49, %v821_v59  ;;  %v976_v50 = vld [vmem:[#allocation3 + $0x60] sm:$0xf] }
 0x313   : > { %829 = vst [vmem:[#allocation3 + $0x18] sm:$0xf] %v824_v31  ;;  %v985_v53 = vpack.c.bf16 %v976_v50, %v976_v50 }
 0x315   : > { %v998_v54 = vsel %vm1785_vm9, %v985_v53, 0 }
 0x316   : > { %1011 = vmatpush.bf16.msra.mxu3 %v998_v54 }
 0x318   : > { %v954_v57 = vpop.permute.xlu1 %953 }
 0x319   : > { %v956_v41 = vsel %vm461_vm8, %v952_v25, %v954_v57  ;;  %962 = vst.msk [vmem:[#allocation3 + $0x70] sm:$0xf] %vm287_vm0, %v954_v57  ;;  %v846_v60 = vpop.permute.xlu0 %845  ;;  %vm1788_vm8 = vmmov %vm1785_vm9 }
 0x31a   : > { %961 = vst [vmem:[#allocation3 + $0x68] sm:$0xf] %v956_v41  ;;  %v849_v61 = vsel %vm1786_vm6, %v844_v14, %v846_v60  ;;  %v850_v62 = vsel %vm1787_vm15, %v846_v60, %v848_v48  ;;  %1012 = vmatpush.bf16.msra.mxu3 %v982_v58  ;;  %vm1789_vm10 = vmmov %vm1788_vm8  ;;  %v1056_v14 = vpop.permute.xlu2 %1055 }
 0x31b   : > { %854 = vst [vmem:[#allocation3 + $0x18] sm:$0xf0] %v849_v61 }
 0x31c   : > { %855 = vst [vmem:[#allocation3 + $0x20] sm:$0xf0] %v850_v62 }
 0x320   : > { %v913_v63 = vpop.permute.xlu1 %912  ;;  %v978_v0 = vld [vmem:[#allocation3 + $0x70] sm:$0xf] }
 0x321   : > { %v915_v2 = vsel %vm418_vm5, %v911_v22, %v913_v63  ;;  %921 = vst.msk [vmem:[#allocation3 + $0x58] sm:$0xf] %vm287_vm0, %v913_v63  ;;  %v889_v5 = vpop.permute.xlu0 %888  ;;  %v987_v6 = vpack.c.bf16 %v978_v0, %v978_v0  ;;  %v977_v7 = vld [vmem:[#allocation3 + $0x68] sm:$0xf]  ;;  %vm1790_vm5 = vcmask 293888  }
 0x322   : > { %920 = vst [vmem:[#allocation3 + $0x50] sm:$0xf] %v915_v2  ;;  %v891_v28 = vsel %vm393_vm4, %v887_v37, %v889_v5  ;;  %v967_v10 = vld [vmem:[#allocation3 + $0x18] sm:$0xff]  ;;  %v986_v46 = vpack.c.bf16 %v977_v7, %v977_v7 }
 0x323   : > { %896 = vst [vmem:[#allocation3 + $0x38] sm:$0xf0] %v891_v28  ;;  %v979_v13 = vpack.c.bf16 %v967_v10, %v964_v9  ;;  %v1004_v17 = vsel %vm1788_vm8, %v987_v6, 0 }
 0x324   : > { %897 = vst.msk [vmem:[#allocation3 + $0x40] sm:$0xf0] %vm310_vm1, %v889_v5  ;;  %1037 = vmatpush.bf16.msrb.mxu0 %v1004_v17  ;;  %v1001_v19 = vsel %vm1789_vm10, %v986_v46, 0 }
 0x325   : > { %1013 = vmatpush.bf16.msra.mxu3 %v979_v13 }
 0x328   : > { %1180 = vmatmul.msk.bf16.vlgmr.msra.gmra.mxu3 %vm1790_vm5, %v963_v3  ;;  %v823_v20 = vpop.permute.xlu1 %822  ;;  %v975_v26 = vld [vmem:[#allocation3 + $0x58] sm:$0xff] }
 0x329   : > { %1024 = vmatpush.bf16.msrb.mxu3 %v1001_v19  ;;  %v825_v21 = vsel %vm324_vm7, %v821_v59, %v823_v20  ;;  %831 = vst.msk [vmem:[#allocation3 + $0x28] sm:$0xf] %vm287_vm0, %v823_v20  ;;  %v803_v24 = vpop.permute.xlu0 %802  ;;  %v974_v27 = vld [vmem:[#allocation3 + $0x50] sm:$0xff] }
 0x32a   : > { %830 = vst [vmem:[#allocation3 + $0x20] sm:$0xf] %v825_v21  ;;  %v805_v29 = vsel %vm302_vm2, %v1696_v32, %v803_v24  ;;  %v971_v30 = vld [vmem:[#allocation3 + $0x38] sm:$0xff]  ;;  %vm1791_vm2 = vmmov %vm1790_vm5 }
 0x32b   : > { %810 = vst [vmem:[#allocation3 + $0x8] sm:$0xf0] %v805_v29  ;;  %v972_v15 = vld [vmem:[#allocation3 + $0x40] sm:$0xff]  ;;  %v983_v1 = vpack.c.bf16 %v974_v27, %v971_v30  ;;  %vm1792_vm4 = vmmov %vm1791_vm2 }
 0x32c   : > { %811 = vst.msk [vmem:[#allocation3 + $0x10] sm:$0xf0] %vm310_vm1, %v803_v24  ;;  %v984_v8 = vpack.c.bf16 %v975_v26, %v972_v15 }
 0x32d   : > { %1025 = vmatpush.bf16.msrb.mxu3 %v983_v1 }
 0x32e   : > { %1038 = vmatpush.bf16.msrb.mxu0 %v984_v8 }
 0x330   : > { %v969_v40 = vld [vmem:[#allocation3 + $0x28] sm:$0xff]  ;;  %v1054_v22 = vpop.permute.xlu1 %1053 }
 0x331   : > { %v968_v52 = vld [vmem:[#allocation3 + $0x20] sm:$0xff]  ;;  %v992_v35 = vpop.permute.xlu0 %991  ;;  %v1058_v18 = vsel %vm371_vm3, %v1054_v22, %v1056_v14 }
 0x332   : > { %v965_v33 = vld [vmem:[#allocation3 + $0x8] sm:$0xff] }
 0x333   : > { %v966_v51 = vld [vmem:[#allocation3 + $0x10] sm:$0xff]  ;;  %v980_v34 = vpack.c.bf16 %v968_v52, %v965_v33 }
 0x334   : > { %v981_v37 = vpack.c.bf16 %v969_v40, %v966_v51 }
 0x335   : > { %1026 = vmatpush.bf16.msrb.mxu3 %v980_v34 }
 0x336   : > { %1039 = vmatpush.bf16.msrb.mxu0 %v981_v37 }
 0x338   : > { %1181 = vmatmul.msk.bf16.vlgmr.msrb.gmra.mxu3 %vm1791_vm2, %v963_v3 }
 0x339   : > { %1182 = vmatmul.msk.bf16.vlgmr.msrb.gmra.mxu0 %vm1792_vm4, %v963_v3  ;;  %v1052_v11 = vpop.permute.xlu0 %1051 }
 0x33a   : > { %v1057_v47 = vsel %vm371_vm3, %v1052_v11, %v1054_v22 }
 0x3ab   : > { %v1015_v32 = vpop.f32.mrf.mxu3 }
 0x3ac   : > { %v1016_v42 = vadd.f32 %v1015_v32, %v992_v35 }
 0x3ae   : > { %v1062_v25 = vadd.f32 %v1057_v47, %v1016_v42 }
 0x3b3   : > { %v1017_v39 = vpop.f32.mrf.mxu3 }
 0x3b6   : > { %v1041_v38 = vpop.f32.mrf.mxu0 }
 0x3b7   : > { %v1042_v43 = vadd.f32 %v1041_v38, %v992_v35 }
 0x3b9   : > { %v1064_v44 = vadd.f32 %v1056_v14, %v1042_v43 }
 0x3bb   : > { %v1028_v4 = vpop.f32.mrf.mxu3  ;;  %1071 = vst.msk [vmem:[%s234_s7 + $0x8] sm:$0xf] %vm287_vm0, %v1064_v44  ;;  %vm1793_vm0 = vcmask 1043456  }
 0x3bc   : > { %v1029_v45 = vadd.f32 %v1028_v4, %v992_v35 }
 0x3be   : > { %v1063_v36 = vadd.f32 %v1058_v18, %v1029_v45  ;;  %v1043_v23 = vpop.f32.mrf.mxu0 }
 0x3c0   : > { %v1067_v48 = vrot.slane %v1063_v36, 4 }
 0x3c2   : > { %v1068_v16 = vsel %vm1793_vm0, %v1062_v25, %v1067_v48 }
 0x3c3   : > { %v1030_v12 = vpop.f32.mrf.mxu3  ;;  %1070 = vst [vmem:[%s234_s7] sm:$0xff] %v1068_v16 }
 0x3c4   : > { %1325 = shalt.err (!%p1322_p8)
}
 0x3c5   : > { %1194 = dma.vmem_to_hbm [thread:$0]  (%p1448_p5), %s1087_s22, 192, %s1089_s11, %s1073_s12  }
 0x3c6 PF: > { %p1206_p9 = scmp.ge.s32.totalorder %s1364_s21, 2  ;;  %s1100_s25 = sand.u32 1, %s1352_s18  }
 0x3c7   : > { %s1101_s26 = scalar_lea.sflag [#allocation7], %s1100_s25 }
 0x3c8   : > { %p1201_p10 = pnand %p1206_p9, %p1452_p6 }
 0x3ca   : > { %p1202_p11 = pneg %p1201_p10 }
 0x3cc   : > { %1347 = dma.done.wait (%p1202_p11), %s1101_s26, 192  }
 0x3cd   : > { %1349 = vsyncadd (%p1202_p11), %s1101_s26, 4294967104  ;;  %p16_p12 = scmp.ge.s32.totalorder %s1435_s24, 4   ;;  %s1794_s18 = smov %s1356_s19 }
 0x3ce   : > { %s1795_s19 = smov %s1360_s20  ;;  %s1796_s20 = smov %s1446_s27 }
 0x3cf   : > { %s1797_s21 = smov %s1435_s24  ;;  %18 = sbr.rel (!%p16_p12) target bundleno = 4 (0x4), region = 109 }
 0x3d4   :  { %1107 = vsyncpa [#allocation6], 1 }
 0x3d5   :  { %1109 = vsyncpa [#allocation6 + $0x1], 1 }
 0x3d6   :  { %1110 = vsyncpa [#allocation7], 1 }
 0x3d7   :  { %1112 = vsyncpa [#allocation7 + $0x1], 1 }

</bundles_post_ra>
